<compile_context>
chip_gen: v7x
topology: tpu7x:2x2x1
jax: 0.10.0
libtpu: 0.0.40
codegen_flags: <defaults>
</compile_context>

<pallas_src>
import jax
import jax.numpy as jnp
import numpy as np
from jax import lax
from jax.experimental import pallas as pl
from jax.experimental.pallas import tpu as pltpu

HIDDEN = 10
LANES = 128
SUBLANES = 8
BLOCK_ROWS_MAX = 256   # 256*128 = 32768 elems -> 128 KiB per f32 block
CHUNK_ROWS = 16        # in-kernel sub-chunk: 2 vregs per array, ~14 live vregs

# Flat parameter layout (141 f32 scalars in SMEM; 1D f32[141] pads to 1 KiB).
_W1 = 0
_B1 = _W1 + HIDDEN
_W2 = _B1 + HIDDEN                 # row-major: w2[j, i] at _W2 + j*HIDDEN + i
_B2 = _W2 + HIDDEN * HIDDEN
_W3 = _B2 + HIDDEN
_B3 = _W3 + HIDDEN
N_PARAMS = _B3 + 1                 # 141


def _round_up(x, m):
    return ((x + m - 1) // m) * m


def generator_kernel(x_ref, w_ref, o_ref):
    # All parameters as SMEM scalars: scalar operands broadcast into VPU ops
    # for free -- no lane/sublane broadcasts, no weight-slab slicing.
    w1 = [w_ref[_W1 + i] for i in range(HIDDEN)]
    b1 = [w_ref[_B1 + i] for i in range(HIDDEN)]
    w2 = [[w_ref[_W2 + j * HIDDEN + i] for i in range(HIDDEN)]
          for j in range(HIDDEN)]
    b2 = [w_ref[_B2 + j] for j in range(HIDDEN)]
    w3 = [w_ref[_W3 + j] for j in range(HIDDEN)]
    b3 = w_ref[_B3]

    block_rows = x_ref.shape[0]
    chunk = min(CHUNK_ROWS, block_rows)
    n_chunks = block_rows // chunk

    def process(r0):
        x = x_ref[pl.ds(r0, chunk), :]                     # (chunk, 128) dense
        # Layer 1: Linear(1,10) + ReLU as scalar-broadcast VPU FMAs.
        h1 = [jnp.maximum(w1[i] * x + b1[i], 0.0) for i in range(HIDDEN)]
        # Layers 2 + 3 fused:
        #   out = b3 + sum_j w3_j * relu(b2_j + sum_i w2_ji * h1_i)
        out = None
        for j in range(HIDDEN):
            acc = w2[j][0] * h1[0] + b2[j]
            for i in range(1, HIDDEN):
                acc = acc + w2[j][i] * h1[i]
            term = w3[j] * jnp.maximum(acc, 0.0)
            out = term if out is None else out + term
        o_ref[pl.ds(r0, chunk), :] = out + b3

    if n_chunks == 1:
        process(0)
    else:
        # fori_loop (not a Python for) bounds live ranges to ~one chunk so
        # nothing spills at 256-row blocks; unroll=2 amortizes loop overhead.
        def body(c, carry):
            process(pl.multiple_of(c * chunk, chunk))
            return carry

        lax.fori_loop(0, n_chunks, body, 0, unroll=2)


def pack_params(params):
    """Pack all weights/biases into one flat f32[141] SMEM scalar table."""
    return jnp.concatenate([
        params["w1"].reshape(-1),        # (10,)  l1.weight[:, 0]
        params["b1"].reshape(-1),        # (10,)  l1.bias
        params["w2"].reshape(-1),        # (100,) l2.weight row-major (out, in)
        params["b2"].reshape(-1),        # (10,)  l2.bias
        params["w3"].reshape(-1),        # (10,)  l3.weight[0, :]
        params["b3"].reshape(-1),        # (1,)   l3.bias
    ]).astype(jnp.float32)


def _choose_tiling(n):
    """Return (rows_padded, block_rows) for the dense (rows, 128) layout."""
    rows = _round_up(_round_up(max(n, 1), LANES) // LANES, SUBLANES)
    if rows <= SUBLANES:
        return rows, rows
    # >= 2 blocks so ("parallel",) can shard across both v7x TensorCores; cap
    # the block at 256x128 elems (128 KiB f32) -- trivially within VMEM even
    # double-buffered, and large enough to amortize per-step overhead.
    tr = min(BLOCK_ROWS_MAX, max(2 * SUBLANES, (rows // 2) // 16 * 16))
    rows = _round_up(rows, tr)
    return rows, tr


@jax.jit
def generator_forward(x, params):
    """x: (N, 1) float32 (PyTorch Linear convention); returns (N, 1) float32."""
    n = x.shape[0]
    rows, tr = _choose_tiling(n)
    num_blocks = rows // tr
    n_pad = rows * LANES

    # Dense (rows, 128) layout; skip the pad when the batch already fits.
    x_flat = x.reshape(-1).astype(jnp.float32)
    if n_pad != n:
        x_flat = jnp.pad(x_flat, (0, n_pad - n))
    x_2d = x_flat.reshape(rows, LANES)
    w_flat = pack_params(params)

    out_2d = pl.pallas_call(
        generator_kernel,
        out_shape=jax.ShapeDtypeStruct((rows, LANES), jnp.float32),
        grid=(num_blocks,),
        in_specs=[
            pl.BlockSpec((tr, LANES), lambda i: (i, 0)),          # batch tile
            pl.BlockSpec(memory_space=pltpu.MemorySpace.SMEM),    # scalar table
        ],
        out_specs=pl.BlockSpec((tr, LANES), lambda i: (i, 0)),
        compiler_params=pltpu.CompilerParams(
            dimension_semantics=("parallel",)),
        cost_estimate=pl.CostEstimate(
            flops=240 * n_pad,
            transcendentals=0,
            bytes_accessed=8 * n_pad + 4 * N_PARAMS),
    )(x_2d, w_flat)

    out_flat = out_2d.reshape(-1)
    if n_pad != n:
        out_flat = out_flat[:n]
    return out_flat.reshape(n, 1)


def init_params(key):
    """Deterministic init matching PyTorch Linear shapes and U(+/-1/sqrt(fan_in))."""
    ks = jax.random.split(key, 6)

    def u(k, shape, fan_in):
        bound = 1.0 / np.sqrt(fan_in)
        return jax.random.uniform(k, shape, jnp.float32, -bound, bound)

    return {
        "w1": u(ks[0], (HIDDEN, 1), 1),            # torch Linear(1,10).weight
        "b1": u(ks[1], (HIDDEN,), 1),
        "w2": u(ks[2], (HIDDEN, HIDDEN), HIDDEN),  # torch Linear(10,10).weight
        "b2": u(ks[3], (HIDDEN,), HIDDEN),
        "w3": u(ks[4], (1, HIDDEN), HIDDEN),       # torch Linear(10,1).weight
        "b3": u(ks[5], (1,), HIDDEN),
    }


def reference_forward(x, p):
    h1 = jnp.maximum(x @ p["w1"].T + p["b1"], 0.0)
    h2 = jnp.maximum(
        jnp.dot(h1, p["w2"].T, precision=jax.lax.Precision.HIGHEST) + p["b2"],
        0.0)
    return jnp.dot(h2, p["w3"].T, precision=jax.lax.Precision.HIGHEST) + p["b3"]


if __name__ == "__main__":
    key = jax.random.PRNGKey(0)
    pkey, xkey = jax.random.split(key)
    params = init_params(pkey)

    # Tiny GAN-style batch (8,1), a ragged batch (padding path + multi-block),
    # and a multi-block / multi-chunk batch (fori_loop + megacore path).
    for n in (8, 4101, 8192):
        x = jax.random.normal(jax.random.fold_in(xkey, n), (n, 1), jnp.float32)
        out = jax.block_until_ready(generator_forward(x, params))
        ref = reference_forward(x, params)
        np.testing.assert_allclose(np.asarray(out), np.asarray(ref),
                                   rtol=1e-5, atol=1e-5)

    print("KERNEL_OK")
</pallas_src>

<mosaic_0001>
module attributes {stable_mosaic.version = 11 : i64} {
  func.func @generator_kernel(%arg0: i32, %arg1: memref<8x128xf32, #tpu.memory_space<vmem>>, %arg2: memref<141xf32, #tpu.memory_space<smem>>, %arg3: memref<8x128xf32, #tpu.memory_space<vmem>>) attributes {dimension_semantics = [#tpu.dimension_semantics<parallel>], iteration_bounds = array<i64: 1>, scalar_prefetch = 0 : i64, scratch_operands = 0 : i64, tpu.core_type = #tpu.core_type<tc>, window_params = [{transform_indices = @transform_0, window_bounds = array<i64: 8, 128>}, {transform_indices = @transform_1, window_bounds = array<i64: 141>}, {transform_indices = @transform_2, window_bounds = array<i64: 8, 128>}]} {
    %c0 = arith.constant 0 : index
    %0 = memref.load %arg2[%c0] : memref<141xf32, #tpu.memory_space<smem>>
    %c1 = arith.constant 1 : index
    %1 = memref.load %arg2[%c1] : memref<141xf32, #tpu.memory_space<smem>>
    %c2 = arith.constant 2 : index
    %2 = memref.load %arg2[%c2] : memref<141xf32, #tpu.memory_space<smem>>
    %c3 = arith.constant 3 : index
    %3 = memref.load %arg2[%c3] : memref<141xf32, #tpu.memory_space<smem>>
    %c4 = arith.constant 4 : index
    %4 = memref.load %arg2[%c4] : memref<141xf32, #tpu.memory_space<smem>>
    %c5 = arith.constant 5 : index
    %5 = memref.load %arg2[%c5] : memref<141xf32, #tpu.memory_space<smem>>
    %c6 = arith.constant 6 : index
    %6 = memref.load %arg2[%c6] : memref<141xf32, #tpu.memory_space<smem>>
    %c7 = arith.constant 7 : index
    %7 = memref.load %arg2[%c7] : memref<141xf32, #tpu.memory_space<smem>>
    %c8 = arith.constant 8 : index
    %8 = memref.load %arg2[%c8] : memref<141xf32, #tpu.memory_space<smem>>
    %c9 = arith.constant 9 : index
    %9 = memref.load %arg2[%c9] : memref<141xf32, #tpu.memory_space<smem>>
    %c10 = arith.constant 10 : index
    %10 = memref.load %arg2[%c10] : memref<141xf32, #tpu.memory_space<smem>>
    %c11 = arith.constant 11 : index
    %11 = memref.load %arg2[%c11] : memref<141xf32, #tpu.memory_space<smem>>
    %c12 = arith.constant 12 : index
    %12 = memref.load %arg2[%c12] : memref<141xf32, #tpu.memory_space<smem>>
    %c13 = arith.constant 13 : index
    %13 = memref.load %arg2[%c13] : memref<141xf32, #tpu.memory_space<smem>>
    %c14 = arith.constant 14 : index
    %14 = memref.load %arg2[%c14] : memref<141xf32, #tpu.memory_space<smem>>
    %c15 = arith.constant 15 : index
    %15 = memref.load %arg2[%c15] : memref<141xf32, #tpu.memory_space<smem>>
    %c16 = arith.constant 16 : index
    %16 = memref.load %arg2[%c16] : memref<141xf32, #tpu.memory_space<smem>>
    %c17 = arith.constant 17 : index
    %17 = memref.load %arg2[%c17] : memref<141xf32, #tpu.memory_space<smem>>
    %c18 = arith.constant 18 : index
    %18 = memref.load %arg2[%c18] : memref<141xf32, #tpu.memory_space<smem>>
    %c19 = arith.constant 19 : index
    %19 = memref.load %arg2[%c19] : memref<141xf32, #tpu.memory_space<smem>>
    %c20 = arith.constant 20 : index
    %20 = memref.load %arg2[%c20] : memref<141xf32, #tpu.memory_space<smem>>
    %c21 = arith.constant 21 : index
    %21 = memref.load %arg2[%c21] : memref<141xf32, #tpu.memory_space<smem>>
    %c22 = arith.constant 22 : index
    %22 = memref.load %arg2[%c22] : memref<141xf32, #tpu.memory_space<smem>>
    %c23 = arith.constant 23 : index
    %23 = memref.load %arg2[%c23] : memref<141xf32, #tpu.memory_space<smem>>
    %c24 = arith.constant 24 : index
    %24 = memref.load %arg2[%c24] : memref<141xf32, #tpu.memory_space<smem>>
    %c25 = arith.constant 25 : index
    %25 = memref.load %arg2[%c25] : memref<141xf32, #tpu.memory_space<smem>>
    %c26 = arith.constant 26 : index
    %26 = memref.load %arg2[%c26] : memref<141xf32, #tpu.memory_space<smem>>
    %c27 = arith.constant 27 : index
    %27 = memref.load %arg2[%c27] : memref<141xf32, #tpu.memory_space<smem>>
    %c28 = arith.constant 28 : index
    %28 = memref.load %arg2[%c28] : memref<141xf32, #tpu.memory_space<smem>>
    %c29 = arith.constant 29 : index
    %29 = memref.load %arg2[%c29] : memref<141xf32, #tpu.memory_space<smem>>
    %c30 = arith.constant 30 : index
    %30 = memref.load %arg2[%c30] : memref<141xf32, #tpu.memory_space<smem>>
    %c31 = arith.constant 31 : index
    %31 = memref.load %arg2[%c31] : memref<141xf32, #tpu.memory_space<smem>>
    %c32 = arith.constant 32 : index
    %32 = memref.load %arg2[%c32] : memref<141xf32, #tpu.memory_space<smem>>
    %c33 = arith.constant 33 : index
    %33 = memref.load %arg2[%c33] : memref<141xf32, #tpu.memory_space<smem>>
    %c34 = arith.constant 34 : index
    %34 = memref.load %arg2[%c34] : memref<141xf32, #tpu.memory_space<smem>>
    %c35 = arith.constant 35 : index
    %35 = memref.load %arg2[%c35] : memref<141xf32, #tpu.memory_space<smem>>
    %c36 = arith.constant 36 : index
    %36 = memref.load %arg2[%c36] : memref<141xf32, #tpu.memory_space<smem>>
    %c37 = arith.constant 37 : index
    %37 = memref.load %arg2[%c37] : memref<141xf32, #tpu.memory_space<smem>>
    %c38 = arith.constant 38 : index
    %38 = memref.load %arg2[%c38] : memref<141xf32, #tpu.memory_space<smem>>
    %c39 = arith.constant 39 : index
    %39 = memref.load %arg2[%c39] : memref<141xf32, #tpu.memory_space<smem>>
    %c40 = arith.constant 40 : index
    %40 = memref.load %arg2[%c40] : memref<141xf32, #tpu.memory_space<smem>>
    %c41 = arith.constant 41 : index
    %41 = memref.load %arg2[%c41] : memref<141xf32, #tpu.memory_space<smem>>
    %c42 = arith.constant 42 : index
    %42 = memref.load %arg2[%c42] : memref<141xf32, #tpu.memory_space<smem>>
    %c43 = arith.constant 43 : index
    %43 = memref.load %arg2[%c43] : memref<141xf32, #tpu.memory_space<smem>>
    %c44 = arith.constant 44 : index
    %44 = memref.load %arg2[%c44] : memref<141xf32, #tpu.memory_space<smem>>
    %c45 = arith.constant 45 : index
    %45 = memref.load %arg2[%c45] : memref<141xf32, #tpu.memory_space<smem>>
    %c46 = arith.constant 46 : index
    %46 = memref.load %arg2[%c46] : memref<141xf32, #tpu.memory_space<smem>>
    %c47 = arith.constant 47 : index
    %47 = memref.load %arg2[%c47] : memref<141xf32, #tpu.memory_space<smem>>
    %c48 = arith.constant 48 : index
    %48 = memref.load %arg2[%c48] : memref<141xf32, #tpu.memory_space<smem>>
    %c49 = arith.constant 49 : index
    %49 = memref.load %arg2[%c49] : memref<141xf32, #tpu.memory_space<smem>>
    %c50 = arith.constant 50 : index
    %50 = memref.load %arg2[%c50] : memref<141xf32, #tpu.memory_space<smem>>
    %c51 = arith.constant 51 : index
    %51 = memref.load %arg2[%c51] : memref<141xf32, #tpu.memory_space<smem>>
    %c52 = arith.constant 52 : index
    %52 = memref.load %arg2[%c52] : memref<141xf32, #tpu.memory_space<smem>>
    %c53 = arith.constant 53 : index
    %53 = memref.load %arg2[%c53] : memref<141xf32, #tpu.memory_space<smem>>
    %c54 = arith.constant 54 : index
    %54 = memref.load %arg2[%c54] : memref<141xf32, #tpu.memory_space<smem>>
    %c55 = arith.constant 55 : index
    %55 = memref.load %arg2[%c55] : memref<141xf32, #tpu.memory_space<smem>>
    %c56 = arith.constant 56 : index
    %56 = memref.load %arg2[%c56] : memref<141xf32, #tpu.memory_space<smem>>
    %c57 = arith.constant 57 : index
    %57 = memref.load %arg2[%c57] : memref<141xf32, #tpu.memory_space<smem>>
    %c58 = arith.constant 58 : index
    %58 = memref.load %arg2[%c58] : memref<141xf32, #tpu.memory_space<smem>>
    %c59 = arith.constant 59 : index
    %59 = memref.load %arg2[%c59] : memref<141xf32, #tpu.memory_space<smem>>
    %c60 = arith.constant 60 : index
    %60 = memref.load %arg2[%c60] : memref<141xf32, #tpu.memory_space<smem>>
    %c61 = arith.constant 61 : index
    %61 = memref.load %arg2[%c61] : memref<141xf32, #tpu.memory_space<smem>>
    %c62 = arith.constant 62 : index
    %62 = memref.load %arg2[%c62] : memref<141xf32, #tpu.memory_space<smem>>
    %c63 = arith.constant 63 : index
    %63 = memref.load %arg2[%c63] : memref<141xf32, #tpu.memory_space<smem>>
    %c64 = arith.constant 64 : index
    %64 = memref.load %arg2[%c64] : memref<141xf32, #tpu.memory_space<smem>>
    %c65 = arith.constant 65 : index
    %65 = memref.load %arg2[%c65] : memref<141xf32, #tpu.memory_space<smem>>
    %c66 = arith.constant 66 : index
    %66 = memref.load %arg2[%c66] : memref<141xf32, #tpu.memory_space<smem>>
    %c67 = arith.constant 67 : index
    %67 = memref.load %arg2[%c67] : memref<141xf32, #tpu.memory_space<smem>>
    %c68 = arith.constant 68 : index
    %68 = memref.load %arg2[%c68] : memref<141xf32, #tpu.memory_space<smem>>
    %c69 = arith.constant 69 : index
    %69 = memref.load %arg2[%c69] : memref<141xf32, #tpu.memory_space<smem>>
    %c70 = arith.constant 70 : index
    %70 = memref.load %arg2[%c70] : memref<141xf32, #tpu.memory_space<smem>>
    %c71 = arith.constant 71 : index
    %71 = memref.load %arg2[%c71] : memref<141xf32, #tpu.memory_space<smem>>
    %c72 = arith.constant 72 : index
    %72 = memref.load %arg2[%c72] : memref<141xf32, #tpu.memory_space<smem>>
    %c73 = arith.constant 73 : index
    %73 = memref.load %arg2[%c73] : memref<141xf32, #tpu.memory_space<smem>>
    %c74 = arith.constant 74 : index
    %74 = memref.load %arg2[%c74] : memref<141xf32, #tpu.memory_space<smem>>
    %c75 = arith.constant 75 : index
    %75 = memref.load %arg2[%c75] : memref<141xf32, #tpu.memory_space<smem>>
    %c76 = arith.constant 76 : index
    %76 = memref.load %arg2[%c76] : memref<141xf32, #tpu.memory_space<smem>>
    %c77 = arith.constant 77 : index
    %77 = memref.load %arg2[%c77] : memref<141xf32, #tpu.memory_space<smem>>
    %c78 = arith.constant 78 : index
    %78 = memref.load %arg2[%c78] : memref<141xf32, #tpu.memory_space<smem>>
    %c79 = arith.constant 79 : index
    %79 = memref.load %arg2[%c79] : memref<141xf32, #tpu.memory_space<smem>>
    %c80 = arith.constant 80 : index
    %80 = memref.load %arg2[%c80] : memref<141xf32, #tpu.memory_space<smem>>
    %c81 = arith.constant 81 : index
    %81 = memref.load %arg2[%c81] : memref<141xf32, #tpu.memory_space<smem>>
    %c82 = arith.constant 82 : index
    %82 = memref.load %arg2[%c82] : memref<141xf32, #tpu.memory_space<smem>>
    %c83 = arith.constant 83 : index
    %83 = memref.load %arg2[%c83] : memref<141xf32, #tpu.memory_space<smem>>
    %c84 = arith.constant 84 : index
    %84 = memref.load %arg2[%c84] : memref<141xf32, #tpu.memory_space<smem>>
    %c85 = arith.constant 85 : index
    %85 = memref.load %arg2[%c85] : memref<141xf32, #tpu.memory_space<smem>>
    %c86 = arith.constant 86 : index
    %86 = memref.load %arg2[%c86] : memref<141xf32, #tpu.memory_space<smem>>
    %c87 = arith.constant 87 : index
    %87 = memref.load %arg2[%c87] : memref<141xf32, #tpu.memory_space<smem>>
    %c88 = arith.constant 88 : index
    %88 = memref.load %arg2[%c88] : memref<141xf32, #tpu.memory_space<smem>>
    %c89 = arith.constant 89 : index
    %89 = memref.load %arg2[%c89] : memref<141xf32, #tpu.memory_space<smem>>
    %c90 = arith.constant 90 : index
    %90 = memref.load %arg2[%c90] : memref<141xf32, #tpu.memory_space<smem>>
    %c91 = arith.constant 91 : index
    %91 = memref.load %arg2[%c91] : memref<141xf32, #tpu.memory_space<smem>>
    %c92 = arith.constant 92 : index
    %92 = memref.load %arg2[%c92] : memref<141xf32, #tpu.memory_space<smem>>
    %c93 = arith.constant 93 : index
    %93 = memref.load %arg2[%c93] : memref<141xf32, #tpu.memory_space<smem>>
    %c94 = arith.constant 94 : index
    %94 = memref.load %arg2[%c94] : memref<141xf32, #tpu.memory_space<smem>>
    %c95 = arith.constant 95 : index
    %95 = memref.load %arg2[%c95] : memref<141xf32, #tpu.memory_space<smem>>
    %c96 = arith.constant 96 : index
    %96 = memref.load %arg2[%c96] : memref<141xf32, #tpu.memory_space<smem>>
    %c97 = arith.constant 97 : index
    %97 = memref.load %arg2[%c97] : memref<141xf32, #tpu.memory_space<smem>>
    %c98 = arith.constant 98 : index
    %98 = memref.load %arg2[%c98] : memref<141xf32, #tpu.memory_space<smem>>
    %c99 = arith.constant 99 : index
    %99 = memref.load %arg2[%c99] : memref<141xf32, #tpu.memory_space<smem>>
    %c100 = arith.constant 100 : index
    %100 = memref.load %arg2[%c100] : memref<141xf32, #tpu.memory_space<smem>>
    %c101 = arith.constant 101 : index
    %101 = memref.load %arg2[%c101] : memref<141xf32, #tpu.memory_space<smem>>
    %c102 = arith.constant 102 : index
    %102 = memref.load %arg2[%c102] : memref<141xf32, #tpu.memory_space<smem>>
    %c103 = arith.constant 103 : index
    %103 = memref.load %arg2[%c103] : memref<141xf32, #tpu.memory_space<smem>>
    %c104 = arith.constant 104 : index
    %104 = memref.load %arg2[%c104] : memref<141xf32, #tpu.memory_space<smem>>
    %c105 = arith.constant 105 : index
    %105 = memref.load %arg2[%c105] : memref<141xf32, #tpu.memory_space<smem>>
    %c106 = arith.constant 106 : index
    %106 = memref.load %arg2[%c106] : memref<141xf32, #tpu.memory_space<smem>>
    %c107 = arith.constant 107 : index
    %107 = memref.load %arg2[%c107] : memref<141xf32, #tpu.memory_space<smem>>
    %c108 = arith.constant 108 : index
    %108 = memref.load %arg2[%c108] : memref<141xf32, #tpu.memory_space<smem>>
    %c109 = arith.constant 109 : index
    %109 = memref.load %arg2[%c109] : memref<141xf32, #tpu.memory_space<smem>>
    %c110 = arith.constant 110 : index
    %110 = memref.load %arg2[%c110] : memref<141xf32, #tpu.memory_space<smem>>
    %c111 = arith.constant 111 : index
    %111 = memref.load %arg2[%c111] : memref<141xf32, #tpu.memory_space<smem>>
    %c112 = arith.constant 112 : index
    %112 = memref.load %arg2[%c112] : memref<141xf32, #tpu.memory_space<smem>>
    %c113 = arith.constant 113 : index
    %113 = memref.load %arg2[%c113] : memref<141xf32, #tpu.memory_space<smem>>
    %c114 = arith.constant 114 : index
    %114 = memref.load %arg2[%c114] : memref<141xf32, #tpu.memory_space<smem>>
    %c115 = arith.constant 115 : index
    %115 = memref.load %arg2[%c115] : memref<141xf32, #tpu.memory_space<smem>>
    %c116 = arith.constant 116 : index
    %116 = memref.load %arg2[%c116] : memref<141xf32, #tpu.memory_space<smem>>
    %c117 = arith.constant 117 : index
    %117 = memref.load %arg2[%c117] : memref<141xf32, #tpu.memory_space<smem>>
    %c118 = arith.constant 118 : index
    %118 = memref.load %arg2[%c118] : memref<141xf32, #tpu.memory_space<smem>>
    %c119 = arith.constant 119 : index
    %119 = memref.load %arg2[%c119] : memref<141xf32, #tpu.memory_space<smem>>
    %c120 = arith.constant 120 : index
    %120 = memref.load %arg2[%c120] : memref<141xf32, #tpu.memory_space<smem>>
    %c121 = arith.constant 121 : index
    %121 = memref.load %arg2[%c121] : memref<141xf32, #tpu.memory_space<smem>>
    %c122 = arith.constant 122 : index
    %122 = memref.load %arg2[%c122] : memref<141xf32, #tpu.memory_space<smem>>
    %c123 = arith.constant 123 : index
    %123 = memref.load %arg2[%c123] : memref<141xf32, #tpu.memory_space<smem>>
    %c124 = arith.constant 124 : index
    %124 = memref.load %arg2[%c124] : memref<141xf32, #tpu.memory_space<smem>>
    %c125 = arith.constant 125 : index
    %125 = memref.load %arg2[%c125] : memref<141xf32, #tpu.memory_space<smem>>
    %c126 = arith.constant 126 : index
    %126 = memref.load %arg2[%c126] : memref<141xf32, #tpu.memory_space<smem>>
    %c127 = arith.constant 127 : index
    %127 = memref.load %arg2[%c127] : memref<141xf32, #tpu.memory_space<smem>>
    %c128 = arith.constant 128 : index
    %128 = memref.load %arg2[%c128] : memref<141xf32, #tpu.memory_space<smem>>
    %c129 = arith.constant 129 : index
    %129 = memref.load %arg2[%c129] : memref<141xf32, #tpu.memory_space<smem>>
    %c130 = arith.constant 130 : index
    %130 = memref.load %arg2[%c130] : memref<141xf32, #tpu.memory_space<smem>>
    %c131 = arith.constant 131 : index
    %131 = memref.load %arg2[%c131] : memref<141xf32, #tpu.memory_space<smem>>
    %c132 = arith.constant 132 : index
    %132 = memref.load %arg2[%c132] : memref<141xf32, #tpu.memory_space<smem>>
    %c133 = arith.constant 133 : index
    %133 = memref.load %arg2[%c133] : memref<141xf32, #tpu.memory_space<smem>>
    %c134 = arith.constant 134 : index
    %134 = memref.load %arg2[%c134] : memref<141xf32, #tpu.memory_space<smem>>
    %c135 = arith.constant 135 : index
    %135 = memref.load %arg2[%c135] : memref<141xf32, #tpu.memory_space<smem>>
    %c136 = arith.constant 136 : index
    %136 = memref.load %arg2[%c136] : memref<141xf32, #tpu.memory_space<smem>>
    %c137 = arith.constant 137 : index
    %137 = memref.load %arg2[%c137] : memref<141xf32, #tpu.memory_space<smem>>
    %c138 = arith.constant 138 : index
    %138 = memref.load %arg2[%c138] : memref<141xf32, #tpu.memory_space<smem>>
    %c139 = arith.constant 139 : index
    %139 = memref.load %arg2[%c139] : memref<141xf32, #tpu.memory_space<smem>>
    %c140 = arith.constant 140 : index
    %140 = memref.load %arg2[%c140] : memref<141xf32, #tpu.memory_space<smem>>
    %c0_0 = arith.constant 0 : index
    %c0_1 = arith.constant 0 : index
    %141 = vector.load %arg1[%c0_0, %c0_1] : memref<8x128xf32, #tpu.memory_space<vmem>>, vector<8x128xf32>
    %142 = vector.broadcast %0 : f32 to vector<8x128xf32>
    %143 = arith.mulf %142, %141 : vector<8x128xf32>
    %144 = vector.broadcast %10 : f32 to vector<8x128xf32>
    %145 = arith.addf %143, %144 : vector<8x128xf32>
    %cst = arith.constant 0.000000e+00 : f32
    %146 = vector.broadcast %cst : f32 to vector<8x128xf32>
    %147 = arith.maximumf %145, %146 : vector<8x128xf32>
    %148 = vector.broadcast %1 : f32 to vector<8x128xf32>
    %149 = arith.mulf %148, %141 : vector<8x128xf32>
    %150 = vector.broadcast %11 : f32 to vector<8x128xf32>
    %151 = arith.addf %149, %150 : vector<8x128xf32>
    %cst_2 = arith.constant 0.000000e+00 : f32
    %152 = vector.broadcast %cst_2 : f32 to vector<8x128xf32>
    %153 = arith.maximumf %151, %152 : vector<8x128xf32>
    %154 = vector.broadcast %2 : f32 to vector<8x128xf32>
    %155 = arith.mulf %154, %141 : vector<8x128xf32>
    %156 = vector.broadcast %12 : f32 to vector<8x128xf32>
    %157 = arith.addf %155, %156 : vector<8x128xf32>
    %cst_3 = arith.constant 0.000000e+00 : f32
    %158 = vector.broadcast %cst_3 : f32 to vector<8x128xf32>
    %159 = arith.maximumf %157, %158 : vector<8x128xf32>
    %160 = vector.broadcast %3 : f32 to vector<8x128xf32>
    %161 = arith.mulf %160, %141 : vector<8x128xf32>
    %162 = vector.broadcast %13 : f32 to vector<8x128xf32>
    %163 = arith.addf %161, %162 : vector<8x128xf32>
    %cst_4 = arith.constant 0.000000e+00 : f32
    %164 = vector.broadcast %cst_4 : f32 to vector<8x128xf32>
    %165 = arith.maximumf %163, %164 : vector<8x128xf32>
    %166 = vector.broadcast %4 : f32 to vector<8x128xf32>
    %167 = arith.mulf %166, %141 : vector<8x128xf32>
    %168 = vector.broadcast %14 : f32 to vector<8x128xf32>
    %169 = arith.addf %167, %168 : vector<8x128xf32>
    %cst_5 = arith.constant 0.000000e+00 : f32
    %170 = vector.broadcast %cst_5 : f32 to vector<8x128xf32>
    %171 = arith.maximumf %169, %170 : vector<8x128xf32>
    %172 = vector.broadcast %5 : f32 to vector<8x128xf32>
    %173 = arith.mulf %172, %141 : vector<8x128xf32>
    %174 = vector.broadcast %15 : f32 to vector<8x128xf32>
    %175 = arith.addf %173, %174 : vector<8x128xf32>
    %cst_6 = arith.constant 0.000000e+00 : f32
    %176 = vector.broadcast %cst_6 : f32 to vector<8x128xf32>
    %177 = arith.maximumf %175, %176 : vector<8x128xf32>
    %178 = vector.broadcast %6 : f32 to vector<8x128xf32>
    %179 = arith.mulf %178, %141 : vector<8x128xf32>
    %180 = vector.broadcast %16 : f32 to vector<8x128xf32>
    %181 = arith.addf %179, %180 : vector<8x128xf32>
    %cst_7 = arith.constant 0.000000e+00 : f32
    %182 = vector.broadcast %cst_7 : f32 to vector<8x128xf32>
    %183 = arith.maximumf %181, %182 : vector<8x128xf32>
    %184 = vector.broadcast %7 : f32 to vector<8x128xf32>
    %185 = arith.mulf %184, %141 : vector<8x128xf32>
    %186 = vector.broadcast %17 : f32 to vector<8x128xf32>
    %187 = arith.addf %185, %186 : vector<8x128xf32>
    %cst_8 = arith.constant 0.000000e+00 : f32
    %188 = vector.broadcast %cst_8 : f32 to vector<8x128xf32>
    %189 = arith.maximumf %187, %188 : vector<8x128xf32>
    %190 = vector.broadcast %8 : f32 to vector<8x128xf32>
    %191 = arith.mulf %190, %141 : vector<8x128xf32>
    %192 = vector.broadcast %18 : f32 to vector<8x128xf32>
    %193 = arith.addf %191, %192 : vector<8x128xf32>
    %cst_9 = arith.constant 0.000000e+00 : f32
    %194 = vector.broadcast %cst_9 : f32 to vector<8x128xf32>
    %195 = arith.maximumf %193, %194 : vector<8x128xf32>
    %196 = vector.broadcast %9 : f32 to vector<8x128xf32>
    %197 = arith.mulf %196, %141 : vector<8x128xf32>
    %198 = vector.broadcast %19 : f32 to vector<8x128xf32>
    %199 = arith.addf %197, %198 : vector<8x128xf32>
    %cst_10 = arith.constant 0.000000e+00 : f32
    %200 = vector.broadcast %cst_10 : f32 to vector<8x128xf32>
    %201 = arith.maximumf %199, %200 : vector<8x128xf32>
    %202 = vector.broadcast %20 : f32 to vector<8x128xf32>
    %203 = arith.mulf %202, %147 : vector<8x128xf32>
    %204 = vector.broadcast %120 : f32 to vector<8x128xf32>
    %205 = arith.addf %203, %204 : vector<8x128xf32>
    %206 = vector.broadcast %21 : f32 to vector<8x128xf32>
    %207 = arith.mulf %206, %153 : vector<8x128xf32>
    %208 = arith.addf %205, %207 : vector<8x128xf32>
    %209 = vector.broadcast %22 : f32 to vector<8x128xf32>
    %210 = arith.mulf %209, %159 : vector<8x128xf32>
    %211 = arith.addf %208, %210 : vector<8x128xf32>
    %212 = vector.broadcast %23 : f32 to vector<8x128xf32>
    %213 = arith.mulf %212, %165 : vector<8x128xf32>
    %214 = arith.addf %211, %213 : vector<8x128xf32>
    %215 = vector.broadcast %24 : f32 to vector<8x128xf32>
    %216 = arith.mulf %215, %171 : vector<8x128xf32>
    %217 = arith.addf %214, %216 : vector<8x128xf32>
    %218 = vector.broadcast %25 : f32 to vector<8x128xf32>
    %219 = arith.mulf %218, %177 : vector<8x128xf32>
    %220 = arith.addf %217, %219 : vector<8x128xf32>
    %221 = vector.broadcast %26 : f32 to vector<8x128xf32>
    %222 = arith.mulf %221, %183 : vector<8x128xf32>
    %223 = arith.addf %220, %222 : vector<8x128xf32>
    %224 = vector.broadcast %27 : f32 to vector<8x128xf32>
    %225 = arith.mulf %224, %189 : vector<8x128xf32>
    %226 = arith.addf %223, %225 : vector<8x128xf32>
    %227 = vector.broadcast %28 : f32 to vector<8x128xf32>
    %228 = arith.mulf %227, %195 : vector<8x128xf32>
    %229 = arith.addf %226, %228 : vector<8x128xf32>
    %230 = vector.broadcast %29 : f32 to vector<8x128xf32>
    %231 = arith.mulf %230, %201 : vector<8x128xf32>
    %232 = arith.addf %229, %231 : vector<8x128xf32>
    %cst_11 = arith.constant 0.000000e+00 : f32
    %233 = vector.broadcast %cst_11 : f32 to vector<8x128xf32>
    %234 = arith.maximumf %232, %233 : vector<8x128xf32>
    %235 = vector.broadcast %130 : f32 to vector<8x128xf32>
    %236 = arith.mulf %235, %234 : vector<8x128xf32>
    %237 = vector.broadcast %30 : f32 to vector<8x128xf32>
    %238 = arith.mulf %237, %147 : vector<8x128xf32>
    %239 = vector.broadcast %121 : f32 to vector<8x128xf32>
    %240 = arith.addf %238, %239 : vector<8x128xf32>
    %241 = vector.broadcast %31 : f32 to vector<8x128xf32>
    %242 = arith.mulf %241, %153 : vector<8x128xf32>
    %243 = arith.addf %240, %242 : vector<8x128xf32>
    %244 = vector.broadcast %32 : f32 to vector<8x128xf32>
    %245 = arith.mulf %244, %159 : vector<8x128xf32>
    %246 = arith.addf %243, %245 : vector<8x128xf32>
    %247 = vector.broadcast %33 : f32 to vector<8x128xf32>
    %248 = arith.mulf %247, %165 : vector<8x128xf32>
    %249 = arith.addf %246, %248 : vector<8x128xf32>
    %250 = vector.broadcast %34 : f32 to vector<8x128xf32>
    %251 = arith.mulf %250, %171 : vector<8x128xf32>
    %252 = arith.addf %249, %251 : vector<8x128xf32>
    %253 = vector.broadcast %35 : f32 to vector<8x128xf32>
    %254 = arith.mulf %253, %177 : vector<8x128xf32>
    %255 = arith.addf %252, %254 : vector<8x128xf32>
    %256 = vector.broadcast %36 : f32 to vector<8x128xf32>
    %257 = arith.mulf %256, %183 : vector<8x128xf32>
    %258 = arith.addf %255, %257 : vector<8x128xf32>
    %259 = vector.broadcast %37 : f32 to vector<8x128xf32>
    %260 = arith.mulf %259, %189 : vector<8x128xf32>
    %261 = arith.addf %258, %260 : vector<8x128xf32>
    %262 = vector.broadcast %38 : f32 to vector<8x128xf32>
    %263 = arith.mulf %262, %195 : vector<8x128xf32>
    %264 = arith.addf %261, %263 : vector<8x128xf32>
    %265 = vector.broadcast %39 : f32 to vector<8x128xf32>
    %266 = arith.mulf %265, %201 : vector<8x128xf32>
    %267 = arith.addf %264, %266 : vector<8x128xf32>
    %cst_12 = arith.constant 0.000000e+00 : f32
    %268 = vector.broadcast %cst_12 : f32 to vector<8x128xf32>
    %269 = arith.maximumf %267, %268 : vector<8x128xf32>
    %270 = vector.broadcast %131 : f32 to vector<8x128xf32>
    %271 = arith.mulf %270, %269 : vector<8x128xf32>
    %272 = arith.addf %236, %271 : vector<8x128xf32>
    %273 = vector.broadcast %40 : f32 to vector<8x128xf32>
    %274 = arith.mulf %273, %147 : vector<8x128xf32>
    %275 = vector.broadcast %122 : f32 to vector<8x128xf32>
    %276 = arith.addf %274, %275 : vector<8x128xf32>
    %277 = vector.broadcast %41 : f32 to vector<8x128xf32>
    %278 = arith.mulf %277, %153 : vector<8x128xf32>
    %279 = arith.addf %276, %278 : vector<8x128xf32>
    %280 = vector.broadcast %42 : f32 to vector<8x128xf32>
    %281 = arith.mulf %280, %159 : vector<8x128xf32>
    %282 = arith.addf %279, %281 : vector<8x128xf32>
    %283 = vector.broadcast %43 : f32 to vector<8x128xf32>
    %284 = arith.mulf %283, %165 : vector<8x128xf32>
    %285 = arith.addf %282, %284 : vector<8x128xf32>
    %286 = vector.broadcast %44 : f32 to vector<8x128xf32>
    %287 = arith.mulf %286, %171 : vector<8x128xf32>
    %288 = arith.addf %285, %287 : vector<8x128xf32>
    %289 = vector.broadcast %45 : f32 to vector<8x128xf32>
    %290 = arith.mulf %289, %177 : vector<8x128xf32>
    %291 = arith.addf %288, %290 : vector<8x128xf32>
    %292 = vector.broadcast %46 : f32 to vector<8x128xf32>
    %293 = arith.mulf %292, %183 : vector<8x128xf32>
    %294 = arith.addf %291, %293 : vector<8x128xf32>
    %295 = vector.broadcast %47 : f32 to vector<8x128xf32>
    %296 = arith.mulf %295, %189 : vector<8x128xf32>
    %297 = arith.addf %294, %296 : vector<8x128xf32>
    %298 = vector.broadcast %48 : f32 to vector<8x128xf32>
    %299 = arith.mulf %298, %195 : vector<8x128xf32>
    %300 = arith.addf %297, %299 : vector<8x128xf32>
    %301 = vector.broadcast %49 : f32 to vector<8x128xf32>
    %302 = arith.mulf %301, %201 : vector<8x128xf32>
    %303 = arith.addf %300, %302 : vector<8x128xf32>
    %cst_13 = arith.constant 0.000000e+00 : f32
    %304 = vector.broadcast %cst_13 : f32 to vector<8x128xf32>
    %305 = arith.maximumf %303, %304 : vector<8x128xf32>
    %306 = vector.broadcast %132 : f32 to vector<8x128xf32>
    %307 = arith.mulf %306, %305 : vector<8x128xf32>
    %308 = arith.addf %272, %307 : vector<8x128xf32>
    %309 = vector.broadcast %50 : f32 to vector<8x128xf32>
    %310 = arith.mulf %309, %147 : vector<8x128xf32>
    %311 = vector.broadcast %123 : f32 to vector<8x128xf32>
    %312 = arith.addf %310, %311 : vector<8x128xf32>
    %313 = vector.broadcast %51 : f32 to vector<8x128xf32>
    %314 = arith.mulf %313, %153 : vector<8x128xf32>
    %315 = arith.addf %312, %314 : vector<8x128xf32>
    %316 = vector.broadcast %52 : f32 to vector<8x128xf32>
    %317 = arith.mulf %316, %159 : vector<8x128xf32>
    %318 = arith.addf %315, %317 : vector<8x128xf32>
    %319 = vector.broadcast %53 : f32 to vector<8x128xf32>
    %320 = arith.mulf %319, %165 : vector<8x128xf32>
    %321 = arith.addf %318, %320 : vector<8x128xf32>
    %322 = vector.broadcast %54 : f32 to vector<8x128xf32>
    %323 = arith.mulf %322, %171 : vector<8x128xf32>
    %324 = arith.addf %321, %323 : vector<8x128xf32>
    %325 = vector.broadcast %55 : f32 to vector<8x128xf32>
    %326 = arith.mulf %325, %177 : vector<8x128xf32>
    %327 = arith.addf %324, %326 : vector<8x128xf32>
    %328 = vector.broadcast %56 : f32 to vector<8x128xf32>
    %329 = arith.mulf %328, %183 : vector<8x128xf32>
    %330 = arith.addf %327, %329 : vector<8x128xf32>
    %331 = vector.broadcast %57 : f32 to vector<8x128xf32>
    %332 = arith.mulf %331, %189 : vector<8x128xf32>
    %333 = arith.addf %330, %332 : vector<8x128xf32>
    %334 = vector.broadcast %58 : f32 to vector<8x128xf32>
    %335 = arith.mulf %334, %195 : vector<8x128xf32>
    %336 = arith.addf %333, %335 : vector<8x128xf32>
    %337 = vector.broadcast %59 : f32 to vector<8x128xf32>
    %338 = arith.mulf %337, %201 : vector<8x128xf32>
    %339 = arith.addf %336, %338 : vector<8x128xf32>
    %cst_14 = arith.constant 0.000000e+00 : f32
    %340 = vector.broadcast %cst_14 : f32 to vector<8x128xf32>
    %341 = arith.maximumf %339, %340 : vector<8x128xf32>
    %342 = vector.broadcast %133 : f32 to vector<8x128xf32>
    %343 = arith.mulf %342, %341 : vector<8x128xf32>
    %344 = arith.addf %308, %343 : vector<8x128xf32>
    %345 = vector.broadcast %60 : f32 to vector<8x128xf32>
    %346 = arith.mulf %345, %147 : vector<8x128xf32>
    %347 = vector.broadcast %124 : f32 to vector<8x128xf32>
    %348 = arith.addf %346, %347 : vector<8x128xf32>
    %349 = vector.broadcast %61 : f32 to vector<8x128xf32>
    %350 = arith.mulf %349, %153 : vector<8x128xf32>
    %351 = arith.addf %348, %350 : vector<8x128xf32>
    %352 = vector.broadcast %62 : f32 to vector<8x128xf32>
    %353 = arith.mulf %352, %159 : vector<8x128xf32>
    %354 = arith.addf %351, %353 : vector<8x128xf32>
    %355 = vector.broadcast %63 : f32 to vector<8x128xf32>
    %356 = arith.mulf %355, %165 : vector<8x128xf32>
    %357 = arith.addf %354, %356 : vector<8x128xf32>
    %358 = vector.broadcast %64 : f32 to vector<8x128xf32>
    %359 = arith.mulf %358, %171 : vector<8x128xf32>
    %360 = arith.addf %357, %359 : vector<8x128xf32>
    %361 = vector.broadcast %65 : f32 to vector<8x128xf32>
    %362 = arith.mulf %361, %177 : vector<8x128xf32>
    %363 = arith.addf %360, %362 : vector<8x128xf32>
    %364 = vector.broadcast %66 : f32 to vector<8x128xf32>
    %365 = arith.mulf %364, %183 : vector<8x128xf32>
    %366 = arith.addf %363, %365 : vector<8x128xf32>
    %367 = vector.broadcast %67 : f32 to vector<8x128xf32>
    %368 = arith.mulf %367, %189 : vector<8x128xf32>
    %369 = arith.addf %366, %368 : vector<8x128xf32>
    %370 = vector.broadcast %68 : f32 to vector<8x128xf32>
    %371 = arith.mulf %370, %195 : vector<8x128xf32>
    %372 = arith.addf %369, %371 : vector<8x128xf32>
    %373 = vector.broadcast %69 : f32 to vector<8x128xf32>
    %374 = arith.mulf %373, %201 : vector<8x128xf32>
    %375 = arith.addf %372, %374 : vector<8x128xf32>
    %cst_15 = arith.constant 0.000000e+00 : f32
    %376 = vector.broadcast %cst_15 : f32 to vector<8x128xf32>
    %377 = arith.maximumf %375, %376 : vector<8x128xf32>
    %378 = vector.broadcast %134 : f32 to vector<8x128xf32>
    %379 = arith.mulf %378, %377 : vector<8x128xf32>
    %380 = arith.addf %344, %379 : vector<8x128xf32>
    %381 = vector.broadcast %70 : f32 to vector<8x128xf32>
    %382 = arith.mulf %381, %147 : vector<8x128xf32>
    %383 = vector.broadcast %125 : f32 to vector<8x128xf32>
    %384 = arith.addf %382, %383 : vector<8x128xf32>
    %385 = vector.broadcast %71 : f32 to vector<8x128xf32>
    %386 = arith.mulf %385, %153 : vector<8x128xf32>
    %387 = arith.addf %384, %386 : vector<8x128xf32>
    %388 = vector.broadcast %72 : f32 to vector<8x128xf32>
    %389 = arith.mulf %388, %159 : vector<8x128xf32>
    %390 = arith.addf %387, %389 : vector<8x128xf32>
    %391 = vector.broadcast %73 : f32 to vector<8x128xf32>
    %392 = arith.mulf %391, %165 : vector<8x128xf32>
    %393 = arith.addf %390, %392 : vector<8x128xf32>
    %394 = vector.broadcast %74 : f32 to vector<8x128xf32>
    %395 = arith.mulf %394, %171 : vector<8x128xf32>
    %396 = arith.addf %393, %395 : vector<8x128xf32>
    %397 = vector.broadcast %75 : f32 to vector<8x128xf32>
    %398 = arith.mulf %397, %177 : vector<8x128xf32>
    %399 = arith.addf %396, %398 : vector<8x128xf32>
    %400 = vector.broadcast %76 : f32 to vector<8x128xf32>
    %401 = arith.mulf %400, %183 : vector<8x128xf32>
    %402 = arith.addf %399, %401 : vector<8x128xf32>
    %403 = vector.broadcast %77 : f32 to vector<8x128xf32>
    %404 = arith.mulf %403, %189 : vector<8x128xf32>
    %405 = arith.addf %402, %404 : vector<8x128xf32>
    %406 = vector.broadcast %78 : f32 to vector<8x128xf32>
    %407 = arith.mulf %406, %195 : vector<8x128xf32>
    %408 = arith.addf %405, %407 : vector<8x128xf32>
    %409 = vector.broadcast %79 : f32 to vector<8x128xf32>
    %410 = arith.mulf %409, %201 : vector<8x128xf32>
    %411 = arith.addf %408, %410 : vector<8x128xf32>
    %cst_16 = arith.constant 0.000000e+00 : f32
    %412 = vector.broadcast %cst_16 : f32 to vector<8x128xf32>
    %413 = arith.maximumf %411, %412 : vector<8x128xf32>
    %414 = vector.broadcast %135 : f32 to vector<8x128xf32>
    %415 = arith.mulf %414, %413 : vector<8x128xf32>
    %416 = arith.addf %380, %415 : vector<8x128xf32>
    %417 = vector.broadcast %80 : f32 to vector<8x128xf32>
    %418 = arith.mulf %417, %147 : vector<8x128xf32>
    %419 = vector.broadcast %126 : f32 to vector<8x128xf32>
    %420 = arith.addf %418, %419 : vector<8x128xf32>
    %421 = vector.broadcast %81 : f32 to vector<8x128xf32>
    %422 = arith.mulf %421, %153 : vector<8x128xf32>
    %423 = arith.addf %420, %422 : vector<8x128xf32>
    %424 = vector.broadcast %82 : f32 to vector<8x128xf32>
    %425 = arith.mulf %424, %159 : vector<8x128xf32>
    %426 = arith.addf %423, %425 : vector<8x128xf32>
    %427 = vector.broadcast %83 : f32 to vector<8x128xf32>
    %428 = arith.mulf %427, %165 : vector<8x128xf32>
    %429 = arith.addf %426, %428 : vector<8x128xf32>
    %430 = vector.broadcast %84 : f32 to vector<8x128xf32>
    %431 = arith.mulf %430, %171 : vector<8x128xf32>
    %432 = arith.addf %429, %431 : vector<8x128xf32>
    %433 = vector.broadcast %85 : f32 to vector<8x128xf32>
    %434 = arith.mulf %433, %177 : vector<8x128xf32>
    %435 = arith.addf %432, %434 : vector<8x128xf32>
    %436 = vector.broadcast %86 : f32 to vector<8x128xf32>
    %437 = arith.mulf %436, %183 : vector<8x128xf32>
    %438 = arith.addf %435, %437 : vector<8x128xf32>
    %439 = vector.broadcast %87 : f32 to vector<8x128xf32>
    %440 = arith.mulf %439, %189 : vector<8x128xf32>
    %441 = arith.addf %438, %440 : vector<8x128xf32>
    %442 = vector.broadcast %88 : f32 to vector<8x128xf32>
    %443 = arith.mulf %442, %195 : vector<8x128xf32>
    %444 = arith.addf %441, %443 : vector<8x128xf32>
    %445 = vector.broadcast %89 : f32 to vector<8x128xf32>
    %446 = arith.mulf %445, %201 : vector<8x128xf32>
    %447 = arith.addf %444, %446 : vector<8x128xf32>
    %cst_17 = arith.constant 0.000000e+00 : f32
    %448 = vector.broadcast %cst_17 : f32 to vector<8x128xf32>
    %449 = arith.maximumf %447, %448 : vector<8x128xf32>
    %450 = vector.broadcast %136 : f32 to vector<8x128xf32>
    %451 = arith.mulf %450, %449 : vector<8x128xf32>
    %452 = arith.addf %416, %451 : vector<8x128xf32>
    %453 = vector.broadcast %90 : f32 to vector<8x128xf32>
    %454 = arith.mulf %453, %147 : vector<8x128xf32>
    %455 = vector.broadcast %127 : f32 to vector<8x128xf32>
    %456 = arith.addf %454, %455 : vector<8x128xf32>
    %457 = vector.broadcast %91 : f32 to vector<8x128xf32>
    %458 = arith.mulf %457, %153 : vector<8x128xf32>
    %459 = arith.addf %456, %458 : vector<8x128xf32>
    %460 = vector.broadcast %92 : f32 to vector<8x128xf32>
    %461 = arith.mulf %460, %159 : vector<8x128xf32>
    %462 = arith.addf %459, %461 : vector<8x128xf32>
    %463 = vector.broadcast %93 : f32 to vector<8x128xf32>
    %464 = arith.mulf %463, %165 : vector<8x128xf32>
    %465 = arith.addf %462, %464 : vector<8x128xf32>
    %466 = vector.broadcast %94 : f32 to vector<8x128xf32>
    %467 = arith.mulf %466, %171 : vector<8x128xf32>
    %468 = arith.addf %465, %467 : vector<8x128xf32>
    %469 = vector.broadcast %95 : f32 to vector<8x128xf32>
    %470 = arith.mulf %469, %177 : vector<8x128xf32>
    %471 = arith.addf %468, %470 : vector<8x128xf32>
    %472 = vector.broadcast %96 : f32 to vector<8x128xf32>
    %473 = arith.mulf %472, %183 : vector<8x128xf32>
    %474 = arith.addf %471, %473 : vector<8x128xf32>
    %475 = vector.broadcast %97 : f32 to vector<8x128xf32>
    %476 = arith.mulf %475, %189 : vector<8x128xf32>
    %477 = arith.addf %474, %476 : vector<8x128xf32>
    %478 = vector.broadcast %98 : f32 to vector<8x128xf32>
    %479 = arith.mulf %478, %195 : vector<8x128xf32>
    %480 = arith.addf %477, %479 : vector<8x128xf32>
    %481 = vector.broadcast %99 : f32 to vector<8x128xf32>
    %482 = arith.mulf %481, %201 : vector<8x128xf32>
    %483 = arith.addf %480, %482 : vector<8x128xf32>
    %cst_18 = arith.constant 0.000000e+00 : f32
    %484 = vector.broadcast %cst_18 : f32 to vector<8x128xf32>
    %485 = arith.maximumf %483, %484 : vector<8x128xf32>
    %486 = vector.broadcast %137 : f32 to vector<8x128xf32>
    %487 = arith.mulf %486, %485 : vector<8x128xf32>
    %488 = arith.addf %452, %487 : vector<8x128xf32>
    %489 = vector.broadcast %100 : f32 to vector<8x128xf32>
    %490 = arith.mulf %489, %147 : vector<8x128xf32>
    %491 = vector.broadcast %128 : f32 to vector<8x128xf32>
    %492 = arith.addf %490, %491 : vector<8x128xf32>
    %493 = vector.broadcast %101 : f32 to vector<8x128xf32>
    %494 = arith.mulf %493, %153 : vector<8x128xf32>
    %495 = arith.addf %492, %494 : vector<8x128xf32>
    %496 = vector.broadcast %102 : f32 to vector<8x128xf32>
    %497 = arith.mulf %496, %159 : vector<8x128xf32>
    %498 = arith.addf %495, %497 : vector<8x128xf32>
    %499 = vector.broadcast %103 : f32 to vector<8x128xf32>
    %500 = arith.mulf %499, %165 : vector<8x128xf32>
    %501 = arith.addf %498, %500 : vector<8x128xf32>
    %502 = vector.broadcast %104 : f32 to vector<8x128xf32>
    %503 = arith.mulf %502, %171 : vector<8x128xf32>
    %504 = arith.addf %501, %503 : vector<8x128xf32>
    %505 = vector.broadcast %105 : f32 to vector<8x128xf32>
    %506 = arith.mulf %505, %177 : vector<8x128xf32>
    %507 = arith.addf %504, %506 : vector<8x128xf32>
    %508 = vector.broadcast %106 : f32 to vector<8x128xf32>
    %509 = arith.mulf %508, %183 : vector<8x128xf32>
    %510 = arith.addf %507, %509 : vector<8x128xf32>
    %511 = vector.broadcast %107 : f32 to vector<8x128xf32>
    %512 = arith.mulf %511, %189 : vector<8x128xf32>
    %513 = arith.addf %510, %512 : vector<8x128xf32>
    %514 = vector.broadcast %108 : f32 to vector<8x128xf32>
    %515 = arith.mulf %514, %195 : vector<8x128xf32>
    %516 = arith.addf %513, %515 : vector<8x128xf32>
    %517 = vector.broadcast %109 : f32 to vector<8x128xf32>
    %518 = arith.mulf %517, %201 : vector<8x128xf32>
    %519 = arith.addf %516, %518 : vector<8x128xf32>
    %cst_19 = arith.constant 0.000000e+00 : f32
    %520 = vector.broadcast %cst_19 : f32 to vector<8x128xf32>
    %521 = arith.maximumf %519, %520 : vector<8x128xf32>
    %522 = vector.broadcast %138 : f32 to vector<8x128xf32>
    %523 = arith.mulf %522, %521 : vector<8x128xf32>
    %524 = arith.addf %488, %523 : vector<8x128xf32>
    %525 = vector.broadcast %110 : f32 to vector<8x128xf32>
    %526 = arith.mulf %525, %147 : vector<8x128xf32>
    %527 = vector.broadcast %129 : f32 to vector<8x128xf32>
    %528 = arith.addf %526, %527 : vector<8x128xf32>
    %529 = vector.broadcast %111 : f32 to vector<8x128xf32>
    %530 = arith.mulf %529, %153 : vector<8x128xf32>
    %531 = arith.addf %528, %530 : vector<8x128xf32>
    %532 = vector.broadcast %112 : f32 to vector<8x128xf32>
    %533 = arith.mulf %532, %159 : vector<8x128xf32>
    %534 = arith.addf %531, %533 : vector<8x128xf32>
    %535 = vector.broadcast %113 : f32 to vector<8x128xf32>
    %536 = arith.mulf %535, %165 : vector<8x128xf32>
    %537 = arith.addf %534, %536 : vector<8x128xf32>
    %538 = vector.broadcast %114 : f32 to vector<8x128xf32>
    %539 = arith.mulf %538, %171 : vector<8x128xf32>
    %540 = arith.addf %537, %539 : vector<8x128xf32>
    %541 = vector.broadcast %115 : f32 to vector<8x128xf32>
    %542 = arith.mulf %541, %177 : vector<8x128xf32>
    %543 = arith.addf %540, %542 : vector<8x128xf32>
    %544 = vector.broadcast %116 : f32 to vector<8x128xf32>
    %545 = arith.mulf %544, %183 : vector<8x128xf32>
    %546 = arith.addf %543, %545 : vector<8x128xf32>
    %547 = vector.broadcast %117 : f32 to vector<8x128xf32>
    %548 = arith.mulf %547, %189 : vector<8x128xf32>
    %549 = arith.addf %546, %548 : vector<8x128xf32>
    %550 = vector.broadcast %118 : f32 to vector<8x128xf32>
    %551 = arith.mulf %550, %195 : vector<8x128xf32>
    %552 = arith.addf %549, %551 : vector<8x128xf32>
    %553 = vector.broadcast %119 : f32 to vector<8x128xf32>
    %554 = arith.mulf %553, %201 : vector<8x128xf32>
    %555 = arith.addf %552, %554 : vector<8x128xf32>
    %cst_20 = arith.constant 0.000000e+00 : f32
    %556 = vector.broadcast %cst_20 : f32 to vector<8x128xf32>
    %557 = arith.maximumf %555, %556 : vector<8x128xf32>
    %558 = vector.broadcast %139 : f32 to vector<8x128xf32>
    %559 = arith.mulf %558, %557 : vector<8x128xf32>
    %560 = arith.addf %524, %559 : vector<8x128xf32>
    %561 = vector.broadcast %140 : f32 to vector<8x128xf32>
    %562 = arith.addf %560, %561 : vector<8x128xf32>
    %c0_21 = arith.constant 0 : index
    %c0_22 = arith.constant 0 : index
    %563 = vector.load %arg3[%c0_21, %c0_22] : memref<8x128xf32, #tpu.memory_space<vmem>>, vector<8x128xf32>
    tpu.vector_store %arg3[%c0_21, %c0_22], %562 {strides = array<i32>} : memref<8x128xf32, #tpu.memory_space<vmem>>, vector<8x128xf32>,
    return
  }
  func.func @transform_0(%arg0: i32) -> (i32, i32) {
    %c0_i32 = arith.constant 0 : i32
    %c0_i32_0 = arith.constant 0 : i32
    return %arg0, %c0_i32 : i32, i32
  }
  func.func @transform_1(%arg0: i32) -> i32 {
    %c0_i32 = arith.constant 0 : i32
    %c0_i32_0 = arith.constant 0 : i32
    return %c0_i32 : i32
  }
  func.func @transform_2(%arg0: i32) -> (i32, i32) {
    %c0_i32 = arith.constant 0 : i32
    %c0_i32_0 = arith.constant 0 : i32
    return %arg0, %c0_i32 : i32, i32
  }
}

</mosaic_0001>

<bundles_post_ra>
// kernel: generator_forward.1
= control target key start
LH: loop header
LB: loop body
LE: loop exit
PB: predicated region body
PF: predicated region fallthrough
CT: control target
= control target key end

     0   :  { %7 = vsyncpa [#allocation3], 0  ;;  %s1545_s0 = inlined_call_operand.vmem [shape: f32[8,128], index: 0, kind: input, shape index: {}]   ;;  %s1546_s1 = inlined_call_operand.vmem [shape: f32[141], index: 1, kind: input, shape index: {}]   ;;  %s1547_s2 = inlined_call_operand.vmem [shape: f32[8,128], index: 2, kind: output, shape index: {}]  }
   0x1   :  { %s16_s11 = sshll.u32 %s1546_s1, 4  ;;  %s17_s11 = int_to_ptr.vmem [resolvable:$true] %s16_s11 }
   0x2   :  { %s714_s12 = scalar_lea.vmem %s17_s11, 32  ;;  %p719_p1 = scmp.lt.s32.totalorder %s17_s11, %s17_s11 }
   0x3   :  { %p715_p0 = scmp.ne.s32.totalorder %s17_s11, %s714_s12  ;;  %p720_p2 = scmp.lt.s32.totalorder %s714_s12, %s714_s12 }
   0x5   :  { %p721_p3 = por %p720_p2, %p719_p1 }
   0x7   :  { %p722_p4 = pnand %p721_p3, %p715_p0 }
   0x9   :  { %725 = shalt.err (!%p722_p4)
}
   0xa   :  { %s728_s13 = smov [#allocation2]  }
   0xb   :  { %19 = dma.vmem_to_smem %s17_s11, 32, %s728_s13, [#allocation3]  }
   0xc   :  { %726 = dma.done.wait [#allocation3], 32  }
   0xd   :  { %727 = vsyncadd [#allocation3], 4294967264 }
   0xe   :  { %23 = sfence }
   0xf   :  { %s24_s14 = sld [smem:[#allocation2]]  ;;  %s573_s15 = sld [smem:[#allocation2 + $0x1]]  ;;  %v165_v0 = vld [vmem:[%s1545_s0] sm:$0xff] }
  0x10   :  { %s574_s16 = sld [smem:[#allocation2 + $0x2]]  ;;  %s575_s17 = sld [smem:[#allocation2 + $0x3]] }
  0x11   :  { %s747_s18 = sld [smem:[#allocation2 + $0x4]]  ;;  %s749_s1 = sld [smem:[#allocation2 + $0x5]] }
  0x12   :  { %s751_s19 = sld [smem:[#allocation2 + $0x6]]  ;;  %s753_s20 = sld [smem:[#allocation2 + $0x7]] }
  0x13   :  { %s755_s21 = sld [smem:[#allocation2 + $0x8]]  ;;  %s757_s22 = sld [smem:[#allocation2 + $0x9]] }
  0x14   :  { %s759_s23 = sld [smem:[#allocation2 + $0xa]]  ;;  %s761_s24 = sld [smem:[#allocation2 + $0xb]] }
  0x15   :  { %s763_s25 = sld [smem:[#allocation2 + $0xc]]  ;;  %s765_s26 = sld [smem:[#allocation2 + $0xd]]  ;;  %v166_v1 = vstv %s24_s14  ;;  %v171_v2 = vstv %s573_s15 }
  0x16   :  { %s767_s27 = sld [smem:[#allocation2 + $0xe]]  ;;  %s769_s28 = sld [smem:[#allocation2 + $0xf]]  ;;  %v176_v3 = vstv %s574_s16  ;;  %v181_v4 = vstv %s575_s17  ;;  %v167_v7 = vmul.f32 %v166_v1, %v165_v0  ;;  %v172_v8 = vmul.f32 %v171_v2, %v165_v0 }
  0x17   :  { %s771_s29 = sld [smem:[#allocation2 + $0x10]]  ;;  %s773_s30 = sld [smem:[#allocation2 + $0x11]]  ;;  %v186_v5 = vstv %s747_s18  ;;  %v191_v6 = vstv %s749_s1  ;;  %v177_v11 = vmul.f32 %v176_v3, %v165_v0  ;;  %v182_v12 = vmul.f32 %v181_v4, %v165_v0 }
  0x18   :  { %s778_s5 = sld [smem:[#allocation2 + $0x12]]  ;;  %s780_s6 = sld [smem:[#allocation2 + $0x13]]  ;;  %v196_v9 = vstv %s751_s19  ;;  %v201_v10 = vstv %s753_s20  ;;  %v187_v17 = vmul.f32 %v186_v5, %v165_v0  ;;  %v192_v18 = vmul.f32 %v191_v6, %v165_v0 }
  0x19   :  { %v206_v13 = vstv %s755_s21  ;;  %v211_v14 = vstv %s757_s22  ;;  %s788_s0 = sld [smem:[#allocation2 + $0x14]]  ;;  %s790_s7 = sld [smem:[#allocation2 + $0x15]]  ;;  %v197_v21 = vmul.f32 %v196_v9, %v165_v0  ;;  %v202_v22 = vmul.f32 %v201_v10, %v165_v0 }
  0x1a   :  { %v168_v15 = vstv %s759_s23  ;;  %v173_v16 = vstv %s761_s24  ;;  %s794_s8 = sld [smem:[#allocation2 + $0x16]]  ;;  %s796_s9 = sld [smem:[#allocation2 + $0x17]]  ;;  %v207_v25 = vmul.f32 %v206_v13, %v165_v0  ;;  %v212_v26 = vmul.f32 %v211_v14, %v165_v0 }
  0x1b   :  { %v178_v19 = vstv %s763_s25  ;;  %v183_v20 = vstv %s765_s26  ;;  %s800_s10 = sld [smem:[#allocation2 + $0x18]]  ;;  %s802_s11 = sld [smem:[#allocation2 + $0x19]]  ;;  %v169_v27 = vadd.f32 %v168_v15, %v167_v7  ;;  %v174_v28 = vadd.f32 %v173_v16, %v172_v8 }
  0x1c   :  { %v188_v23 = vstv %s767_s27  ;;  %v193_v24 = vstv %s769_s28  ;;  %s806_s12 = sld [smem:[#allocation2 + $0x1a]]  ;;  %s808_s13 = sld [smem:[#allocation2 + $0x1b]]  ;;  %v179_v31 = vadd.f32 %v178_v19, %v177_v11  ;;  %v184_v32 = vadd.f32 %v183_v20, %v182_v12 }
  0x1d   :  { %v198_v29 = vstv %s771_s29  ;;  %v203_v30 = vstv %s773_s30  ;;  %s812_s14 = sld [smem:[#allocation2 + $0x1c]]  ;;  %s814_s15 = sld [smem:[#allocation2 + $0x1d]]  ;;  %v189_v35 = vadd.f32 %v188_v23, %v187_v17  ;;  %v194_v36 = vadd.f32 %v193_v24, %v192_v18 }
  0x1e   :  { %v208_v33 = vstv %s778_s5  ;;  %v213_v34 = vstv %s780_s6  ;;  %s818_s16 = sld [smem:[#allocation2 + $0x1e]]  ;;  %s820_s17 = sld [smem:[#allocation2 + $0x1f]]  ;;  %v199_v37 = vadd.f32 %v198_v29, %v197_v21  ;;  %v204_v38 = vadd.f32 %v203_v30, %v202_v22 }
  0x1f   :  { %s822_s18 = sld [smem:[#allocation2 + $0x20]]  ;;  %s824_s1 = sld [smem:[#allocation2 + $0x21]]  ;;  %v830_v39 = vmax.f32 %v169_v27, 0.0  ;;  %v832_v40 = vmax.f32 %v174_v28, 0.0  ;;  %v209_v41 = vadd.f32 %v208_v33, %v207_v25  ;;  %v214_v42 = vadd.f32 %v213_v34, %v212_v26 }
  0x20   :  { %s826_s19 = sld [smem:[#allocation2 + $0x22]]  ;;  %s828_s20 = sld [smem:[#allocation2 + $0x23]]  ;;  %v838_v43 = vmax.f32 %v179_v31, 0.0  ;;  %v840_v44 = vmax.f32 %v184_v32, 0.0  ;;  %v846_v45 = vmax.f32 %v189_v35, 0.0  ;;  %v848_v46 = vmax.f32 %v194_v36, 0.0 }
  0x21   :  { %s834_s21 = sld [smem:[#allocation2 + $0x24]]  ;;  %s836_s22 = sld [smem:[#allocation2 + $0x25]]  ;;  %v854_v47 = vmax.f32 %v199_v37, 0.0  ;;  %v856_v48 = vmax.f32 %v204_v38, 0.0  ;;  %v216_v49 = vstv %s788_s0  ;;  %v220_v50 = vstv %s790_s7 }
  0x22   :  { %s842_s23 = sld [smem:[#allocation2 + $0x26]]  ;;  %s844_s24 = sld [smem:[#allocation2 + $0x27]]  ;;  %1560 = vst [vmem:[#allocation5_spill] sm:$0xff] %v846_v45  ;;  %1561 = vst [vmem:[#allocation6_spill] sm:$0xff] %v848_v46  ;;  %v864_v51 = vmax.f32 %v209_v41, 0.0  ;;  %v866_v52 = vmax.f32 %v214_v42, 0.0  ;;  %v223_v53 = vstv %s794_s8  ;;  %v226_v54 = vstv %s796_s9 }
  0x23   :  { %s850_s25 = sld [smem:[#allocation2 + $0x28]]  ;;  %s852_s26 = sld [smem:[#allocation2 + $0x29]]  ;;  %1562 = vst [vmem:[#allocation7_spill] sm:$0xff] %v854_v47  ;;  %1563 = vst [vmem:[#allocation8_spill] sm:$0xff] %v856_v48  ;;  %v229_v55 = vstv %s800_s10  ;;  %v232_v56 = vstv %s802_s11  ;;  %v235_v57 = vstv %s806_s12  ;;  %v238_v58 = vstv %s808_s13 }
  0x24   :  { %s860_s27 = sld [smem:[#allocation2 + $0x2a]]  ;;  %s862_s28 = sld [smem:[#allocation2 + $0x2b]]  ;;  %1564 = vst [vmem:[#allocation9_spill] sm:$0xff] %v864_v51  ;;  %1565 = vst [vmem:[#allocation10_spill] sm:$0xff] %v866_v52  ;;  %v241_v59 = vstv %s812_s14  ;;  %v244_v60 = vstv %s814_s15  ;;  %v250_v61 = vstv %s818_s16  ;;  %v254_v62 = vstv %s820_s17 }
  0x25   :  { %s870_s29 = sld [smem:[#allocation2 + $0x2c]]  ;;  %s872_s30 = sld [smem:[#allocation2 + $0x2d]]  ;;  %v891_v63 = vmul.f32 %v216_v49, %v830_v39  ;;  %v894_v0 = vmul.f32 %v220_v50, %v832_v40  ;;  %v897_v1 = vmul.f32 %v223_v53, %v838_v43  ;;  %v900_v2 = vmul.f32 %v226_v54, %v840_v44 }
  0x26   :  { %s878_s3 = sld [smem:[#allocation2 + $0x2e]]  ;;  %s880_s4 = sld [smem:[#allocation2 + $0x2f]]  ;;  %v907_v3 = vmul.f32 %v229_v55, %v846_v45  ;;  %v910_v4 = vmul.f32 %v232_v56, %v848_v46  ;;  %v913_v5 = vmul.f32 %v235_v57, %v854_v47  ;;  %v916_v6 = vmul.f32 %v238_v58, %v856_v48 }
  0x27   :  { %s886_s5 = sld [smem:[#allocation2 + $0x30]]  ;;  %s888_s6 = sld [smem:[#allocation2 + $0x31]]  ;;  %v923_v7 = vmul.f32 %v241_v59, %v864_v51  ;;  %v926_v8 = vmul.f32 %v244_v60, %v866_v52  ;;  %v929_v9 = vmul.f32 %v250_v61, %v830_v39  ;;  %v932_v10 = vmul.f32 %v254_v62, %v832_v40 }
  0x28   :  { %s902_s0 = sld [smem:[#allocation2 + $0x32]]  ;;  %s904_s7 = sld [smem:[#allocation2 + $0x33]]  ;;  %1566 = vst [vmem:[#allocation11_spill] sm:$0xff] %v916_v6  ;;  %v257_v11 = vstv %s822_s18  ;;  %v260_v12 = vstv %s824_s1  ;;  %v263_v13 = vstv %s826_s19  ;;  %v266_v14 = vstv %s828_s20 }
  0x29   :  { %s918_s8 = sld [smem:[#allocation2 + $0x34]]  ;;  %s920_s9 = sld [smem:[#allocation2 + $0x35]]  ;;  %1567 = vst [vmem:[#allocation12_spill] sm:$0xff] %v923_v7  ;;  %1568 = vst [vmem:[#allocation13_spill] sm:$0xff] %v926_v8  ;;  %v269_v15 = vstv %s834_s21  ;;  %v272_v16 = vstv %s836_s22  ;;  %v275_v17 = vstv %s842_s23  ;;  %v278_v18 = vstv %s844_s24 }
  0x2a   :  { %s934_s10 = sld [smem:[#allocation2 + $0x36]]  ;;  %s936_s11 = sld [smem:[#allocation2 + $0x37]]  ;;  %v285_v19 = vstv %s850_s25  ;;  %v289_v20 = vstv %s852_s26  ;;  %v292_v21 = vstv %s860_s27  ;;  %v295_v22 = vstv %s862_s28 }
  0x2b   :  { %s942_s12 = sld [smem:[#allocation2 + $0x38]]  ;;  %s944_s13 = sld [smem:[#allocation2 + $0x39]]  ;;  %v963_v23 = vmul.f32 %v257_v11, %v838_v43  ;;  %v966_v24 = vmul.f32 %v260_v12, %v840_v44  ;;  %v969_v25 = vmul.f32 %v263_v13, %v846_v45  ;;  %v972_v26 = vmul.f32 %v266_v14, %v848_v46 }
  0x2c   :  { %s950_s14 = sld [smem:[#allocation2 + $0x3a]]  ;;  %s952_s15 = sld [smem:[#allocation2 + $0x3b]]  ;;  %v979_v27 = vmul.f32 %v269_v15, %v854_v47  ;;  %v982_v28 = vmul.f32 %v272_v16, %v856_v48  ;;  %v985_v29 = vmul.f32 %v275_v17, %v864_v51  ;;  %v988_v30 = vmul.f32 %v278_v18, %v866_v52 }
  0x2d   :  { %s958_s16 = sld [smem:[#allocation2 + $0x3c]]  ;;  %s960_s17 = sld [smem:[#allocation2 + $0x3d]]  ;;  %v995_v31 = vmul.f32 %v285_v19, %v830_v39  ;;  %v998_v32 = vmul.f32 %v289_v20, %v832_v40  ;;  %v1001_v33 = vmul.f32 %v292_v21, %v838_v43  ;;  %v1004_v34 = vmul.f32 %v295_v22, %v840_v44 }
  0x2e   :  { %s974_s18 = sld [smem:[#allocation2 + $0x3e]]  ;;  %s976_s1 = sld [smem:[#allocation2 + $0x3f]]  ;;  %1569 = vst [vmem:[#allocation14_spill] sm:$0xff] %v982_v28  ;;  %1570 = vst [vmem:[#allocation15_spill] sm:$0xff] %v985_v29  ;;  %v298_v35 = vstv %s870_s29  ;;  %v301_v36 = vstv %s872_s30  ;;  %v304_v37 = vstv %s878_s3  ;;  %v307_v38 = vstv %s880_s4 }
  0x2f   :  { %1571 = vst [vmem:[#allocation16_spill] sm:$0xff] %v988_v30  ;;  %s990_s19 = sld [smem:[#allocation2 + $0x40]]  ;;  %s992_s20 = sld [smem:[#allocation2 + $0x41]]  ;;  %v310_v41 = vstv %s886_s5  ;;  %v313_v42 = vstv %s888_s6  ;;  %v320_v49 = vstv %s902_s0  ;;  %v324_v50 = vstv %s904_s7 }
  0x30   :  { %s1006_s21 = sld [smem:[#allocation2 + $0x42]]  ;;  %s1008_s22 = sld [smem:[#allocation2 + $0x43]]  ;;  %v327_v53 = vstv %s918_s8  ;;  %v330_v54 = vstv %s920_s9  ;;  %v333_v55 = vstv %s934_s10  ;;  %v336_v56 = vstv %s936_s11 }
  0x31   :  { %s1014_s23 = sld [smem:[#allocation2 + $0x44]]  ;;  %s1016_s24 = sld [smem:[#allocation2 + $0x45]]  ;;  %v1035_v57 = vmul.f32 %v298_v35, %v846_v45  ;;  %v1038_v58 = vmul.f32 %v301_v36, %v848_v46  ;;  %v1041_v59 = vmul.f32 %v304_v37, %v854_v47  ;;  %v1044_v60 = vmul.f32 %v307_v38, %v856_v48 }
  0x32   :  { %s1022_s25 = sld [smem:[#allocation2 + $0x46]]  ;;  %s1024_s26 = sld [smem:[#allocation2 + $0x47]]  ;;  %v1051_v61 = vmul.f32 %v310_v41, %v864_v51  ;;  %v1054_v62 = vmul.f32 %v313_v42, %v866_v52  ;;  %v1057_v11 = vmul.f32 %v320_v49, %v830_v39  ;;  %v1060_v12 = vmul.f32 %v324_v50, %v832_v40 }
  0x33   :  { %s1030_s27 = sld [smem:[#allocation2 + $0x48]]  ;;  %s1032_s28 = sld [smem:[#allocation2 + $0x49]]  ;;  %1572 = vst [vmem:[#allocation17_spill] sm:$0xff] %v1041_v59  ;;  %1573 = vst [vmem:[#allocation18_spill] sm:$0xff] %v1044_v60  ;;  %v1067_v13 = vmul.f32 %v327_v53, %v838_v43  ;;  %v1070_v14 = vmul.f32 %v330_v54, %v840_v44  ;;  %v1073_v15 = vmul.f32 %v333_v55, %v846_v45  ;;  %v339_v17 = vstv %s942_s12 }
  0x34   :  { %s1046_s29 = sld [smem:[#allocation2 + $0x4a]]  ;;  %s1048_s30 = sld [smem:[#allocation2 + $0x4b]]  ;;  %1574 = vst [vmem:[#allocation19_spill] sm:$0xff] %v1051_v61  ;;  %1575 = vst [vmem:[#allocation20_spill] sm:$0xff] %v1054_v62  ;;  %v1076_v16 = vmul.f32 %v336_v56, %v848_v46  ;;  %v342_v18 = vstv %s944_s13  ;;  %v345_v19 = vstv %s950_s14  ;;  %v348_v20 = vstv %s952_s15 }
  0x35   :  { %s1062_s3 = sld [smem:[#allocation2 + $0x4c]]  ;;  %s1064_s4 = sld [smem:[#allocation2 + $0x4d]]  ;;  %v355_v21 = vstv %s958_s16  ;;  %v359_v22 = vstv %s960_s17  ;;  %v362_v35 = vstv %s974_s18  ;;  %v365_v36 = vstv %s976_s1 }
  0x36   :  { %s1078_s5 = sld [smem:[#allocation2 + $0x4e]]  ;;  %s1080_s6 = sld [smem:[#allocation2 + $0x4f]]  ;;  %v368_v37 = vstv %s990_s19  ;;  %v371_v38 = vstv %s992_s20  ;;  %v374_v41 = vstv %s1006_s21  ;;  %v377_v42 = vstv %s1008_s22 }
  0x37   :  { %s1086_s0 = sld [smem:[#allocation2 + $0x50]]  ;;  %s1088_s7 = sld [smem:[#allocation2 + $0x51]]  ;;  %v1107_v49 = vmul.f32 %v339_v17, %v854_v47  ;;  %v1110_v50 = vmul.f32 %v342_v18, %v856_v48  ;;  %v1113_v53 = vmul.f32 %v345_v19, %v864_v51  ;;  %v1116_v54 = vmul.f32 %v348_v20, %v866_v52 }
  0x38   :  { %s1094_s8 = sld [smem:[#allocation2 + $0x52]]  ;;  %s1096_s9 = sld [smem:[#allocation2 + $0x53]]  ;;  %v1123_v55 = vmul.f32 %v355_v21, %v830_v39  ;;  %v1126_v56 = vmul.f32 %v359_v22, %v832_v40  ;;  %v1129_v17 = vmul.f32 %v362_v35, %v838_v43  ;;  %v1132_v18 = vmul.f32 %v365_v36, %v840_v44 }
  0x39   :  { %s1102_s10 = sld [smem:[#allocation2 + $0x54]]  ;;  %s1104_s11 = sld [smem:[#allocation2 + $0x55]]  ;;  %1576 = vst [vmem:[#allocation21_spill] sm:$0xff] %v1107_v49  ;;  %1577 = vst [vmem:[#allocation22_spill] sm:$0xff] %v1110_v50  ;;  %v1139_v19 = vmul.f32 %v368_v37, %v846_v45  ;;  %v1142_v20 = vmul.f32 %v371_v38, %v848_v46  ;;  %v1145_v21 = vmul.f32 %v374_v41, %v854_v47  ;;  %v380_v35 = vstv %s1014_s23 }
  0x3a   :  { %1578 = vst [vmem:[#allocation23_spill] sm:$0xff] %v1113_v53  ;;  %1579 = vst [vmem:[#allocation24_spill] sm:$0xff] %v1116_v54  ;;  %s1118_s12 = sld [smem:[#allocation2 + $0x56]]  ;;  %s1120_s13 = sld [smem:[#allocation2 + $0x57]]  ;;  %v1148_v22 = vmul.f32 %v377_v42, %v856_v48  ;;  %v383_v36 = vstv %s1016_s24  ;;  %v390_v37 = vstv %s1022_s25  ;;  %v394_v54 = vstv %s1024_s26 }
  0x3b   :  { %s1134_s14 = sld [smem:[#allocation2 + $0x58]]  ;;  %s1136_s15 = sld [smem:[#allocation2 + $0x59]]  ;;  %1580 = vst [vmem:[#allocation25_spill] sm:$0xff] %v1142_v20  ;;  %1581 = vst [vmem:[#allocation26_spill] sm:$0xff] %v1145_v21  ;;  %v397_v38 = vstv %s1030_s27  ;;  %v400_v41 = vstv %s1032_s28  ;;  %v403_v62 = vstv %s1046_s29  ;;  %v406_v42 = vstv %s1048_s30 }
  0x3c   :  { %1582 = vst [vmem:[#allocation27_spill] sm:$0xff] %v1148_v22  ;;  %s1150_s16 = sld [smem:[#allocation2 + $0x5a]]  ;;  %s1152_s17 = sld [smem:[#allocation2 + $0x5b]]  ;;  %v409_v22 = vstv %s1062_s3  ;;  %v412_v30 = vstv %s1064_s4  ;;  %v415_v8 = vstv %s1078_s5  ;;  %v418_v53 = vstv %s1080_s6 }
  0x3d   :  { %s1158_s18 = sld [smem:[#allocation2 + $0x5c]]  ;;  %s1160_s1 = sld [smem:[#allocation2 + $0x5d]]  ;;  %v1179_v61 = vmul.f32 %v380_v35, %v864_v51  ;;  %v1182_v21 = vmul.f32 %v383_v36, %v866_v52  ;;  %v1185_v29 = vmul.f32 %v390_v37, %v830_v39  ;;  %v1188_v7 = vmul.f32 %v394_v54, %v832_v40 }
  0x3e   :  { %s1166_s19 = sld [smem:[#allocation2 + $0x5e]]  ;;  %s1168_s20 = sld [smem:[#allocation2 + $0x5f]]  ;;  %v1195_v35 = vmul.f32 %v397_v38, %v838_v43  ;;  %v1198_v36 = vmul.f32 %v400_v41, %v840_v44  ;;  %v1201_v37 = vmul.f32 %v403_v62, %v846_v45  ;;  %v1204_v54 = vmul.f32 %v406_v42, %v848_v46 }
  0x3f   :  { %s1174_s21 = sld [smem:[#allocation2 + $0x60]]  ;;  %s1176_s22 = sld [smem:[#allocation2 + $0x61]]  ;;  %1583 = vst [vmem:[#allocation28_spill] sm:$0xff] %v1179_v61  ;;  %1584 = vst [vmem:[#allocation29_spill] sm:$0xff] %v1182_v21  ;;  %v1211_v38 = vmul.f32 %v409_v22, %v854_v47  ;;  %v1214_v41 = vmul.f32 %v412_v30, %v856_v48  ;;  %v1217_v62 = vmul.f32 %v415_v8, %v864_v51  ;;  %v425_v21 = vstv %s1086_s0 }
  0x40   :  { %s1190_s23 = sld [smem:[#allocation2 + $0x62]]  ;;  %s1192_s24 = sld [smem:[#allocation2 + $0x63]]  ;;  %1585 = vst [vmem:[#allocation30_spill] sm:$0xff] %v1201_v37  ;;  %1586 = vst [vmem:[#allocation31_spill] sm:$0xff] %v1204_v54  ;;  %v1220_v42 = vmul.f32 %v418_v53, %v866_v52  ;;  %v429_v61 = vstv %s1088_s7  ;;  %v432_v54 = vstv %s1094_s8  ;;  %v435_v22 = vstv %s1096_s9 }
  0x41   :  { %s1206_s25 = sld [smem:[#allocation2 + $0x64]]  ;;  %s1208_s26 = sld [smem:[#allocation2 + $0x65]]  ;;  %1587 = vst [vmem:[#allocation32_spill] sm:$0xff] %v1211_v38  ;;  %1588 = vst [vmem:[#allocation33_spill] sm:$0xff] %v1214_v41  ;;  %v438_v38 = vstv %s1102_s10  ;;  %v441_v50 = vstv %s1104_s11  ;;  %v444_v60 = vstv %s1118_s12  ;;  %v447_v30 = vstv %s1120_s13 }
  0x42   :  { %1589 = vst [vmem:[#allocation34_spill] sm:$0xff] %v1217_v62  ;;  %1590 = vst [vmem:[#allocation35_spill] sm:$0xff] %v1220_v42  ;;  %s1222_s27 = sld [smem:[#allocation2 + $0x66]]  ;;  %s1224_s28 = sld [smem:[#allocation2 + $0x67]]  ;;  %v450_v41 = vstv %s1134_s14  ;;  %v453_v20 = vstv %s1136_s15  ;;  %v460_v28 = vstv %s1150_s16  ;;  %v464_v8 = vstv %s1152_s17 }
  0x43   :  { %v1239_v62 = vmul.f32 %v425_v21, %v830_v39  ;;  %v1242_v53 = vmul.f32 %v429_v61, %v832_v40  ;;  %v1245_v42 = vmul.f32 %v432_v54, %v838_v43  ;;  %v1248_v6 = vmul.f32 %v435_v22, %v840_v44  ;;  %s1250_s29 = sld [smem:[#allocation2 + $0x68]]  ;;  %s1252_s30 = sld [smem:[#allocation2 + $0x69]] }
  0x44   :  { %v1255_v21 = vmul.f32 %v438_v38, %v846_v45  ;;  %v1258_v61 = vmul.f32 %v441_v50, %v848_v46  ;;  %v1261_v54 = vmul.f32 %v444_v60, %v854_v47  ;;  %v1264_v22 = vmul.f32 %v447_v30, %v856_v48  ;;  %s1266_s3 = sld [smem:[#allocation2 + $0x6a]]  ;;  %s1268_s4 = sld [smem:[#allocation2 + $0x6b]] }
  0x45   :  { %1591 = vst [vmem:[#allocation36_spill] sm:$0xff] %v1245_v42  ;;  %1592 = vst [vmem:[#allocation37_spill] sm:$0xff] %v1248_v6  ;;  %v1271_v38 = vmul.f32 %v450_v41, %v864_v51  ;;  %v1274_v50 = vmul.f32 %v453_v20, %v866_v52  ;;  %v1277_v60 = vmul.f32 %v460_v28, %v830_v39  ;;  %s1282_s5 = sld [smem:[#allocation2 + $0x78]]  ;;  %s1284_s6 = sld [smem:[#allocation2 + $0x79]]  ;;  %v470_v41 = vstv %s1160_s1 }
  0x46   :  { %1593 = vst [vmem:[#allocation38_spill] sm:$0xff] %v1255_v21  ;;  %1594 = vst [vmem:[#allocation39_spill] sm:$0xff] %v1258_v61  ;;  %v1280_v30 = vmul.f32 %v464_v8, %v832_v40  ;;  %s1290_s0 = sld [smem:[#allocation2 + $0x7a]]  ;;  %s1292_s7 = sld [smem:[#allocation2 + $0x7b]]  ;;  %v479_v28 = vstv %s1174_s21  ;;  %v482_v20 = vstv %s1176_s22  ;;  %v488_v8 = vstv %s1192_s24 }
  0x47   :  { %1595 = vst [vmem:[#allocation40_spill] sm:$0xff] %v1261_v54  ;;  %1596 = vst [vmem:[#allocation41_spill] sm:$0xff] %v1264_v22  ;;  %v467_v22 = vstv %s1158_s18  ;;  %v476_v54 = vstv %s1168_s20  ;;  %s1298_s8 = sld [smem:[#allocation2 + $0x7c]]  ;;  %s1300_s9 = sld [smem:[#allocation2 + $0x7d]]  ;;  %v495_v61 = vstv %s1206_s25  ;;  %v499_v21 = vstv %s1208_s26 }
  0x48   :  { %1597 = vst [vmem:[#allocation42_spill] sm:$0xff] %v1271_v38  ;;  %1598 = vst [vmem:[#allocation43_spill] sm:$0xff] %v1274_v50  ;;  %v473_v38 = vstv %s1166_s19  ;;  %v485_v50 = vstv %s1190_s23  ;;  %v502_v6 = vstv %s1222_s27  ;;  %s1306_s10 = sld [smem:[#allocation2 + $0x6e]]  ;;  %s1308_s11 = sld [smem:[#allocation2 + $0x6f]]  ;;  %v1311_v37 = vmul.f32 %v467_v22, %v838_v43 }
  0x49   :  { %1599 = vst [vmem:[#allocation44_spill] sm:$0xff] %v1280_v30  ;;  %v505_v30 = vstv %s1224_s28  ;;  %v1314_v49 = vmul.f32 %v470_v41, %v840_v44  ;;  %v1317_v59 = vmul.f32 %v473_v38, %v846_v45  ;;  %v1320_v42 = vmul.f32 %v476_v54, %v848_v46  ;;  %s1322_s12 = sld [smem:[#allocation2 + $0x7e]]  ;;  %s1324_s13 = sld [smem:[#allocation2 + $0x7f]] }
  0x4a   :  { %v1327_v22 = vmul.f32 %v479_v28, %v854_v47  ;;  %v1330_v41 = vmul.f32 %v482_v20, %v856_v48  ;;  %v1333_v38 = vmul.f32 %v485_v50, %v864_v51  ;;  %v1336_v45 = vmul.f32 %v488_v8, %v866_v52  ;;  %s1338_s14 = sld [smem:[#allocation2 + $0x82]]  ;;  %s1352_s15 = sld [smem:[#allocation2 + $0x83]] }
  0x4b   :  { %v1341_v54 = vmul.f32 %v495_v61, %v830_v39  ;;  %v1344_v28 = vmul.f32 %v499_v21, %v832_v40  ;;  %v1347_v20 = vmul.f32 %v502_v6, %v838_v43  ;;  %v1350_v48 = vmul.f32 %v505_v30, %v840_v44  ;;  %s1362_s16 = sld [smem:[#allocation2 + $0x84]]  ;;  %s1420_s17 = sld [smem:[#allocation2 + $0x85]] }
  0x4c   :  { %1600 = vst [vmem:[#allocation45_spill] sm:$0xff] %v1336_v45  ;;  %v218_v50 = vstv %s1282_s5  ;;  %v252_v8 = vstv %s1284_s6  ;;  %v287_v45 = vstv %s1290_s0  ;;  %v322_v47 = vstv %s1292_s7  ;;  %s1426_s18 = sld [smem:[#allocation2 + $0x70]]  ;;  %s1428_s1 = sld [smem:[#allocation2 + $0x71]] }
  0x4d   :  { %1601 = vst [vmem:[#allocation46_spill] sm:$0xff] %v1347_v20  ;;  %1602 = vst [vmem:[#allocation47_spill] sm:$0xff] %v1350_v48  ;;  %v219_v61 = vadd.f32 %v218_v50, %v891_v63  ;;  %v253_v21 = vadd.f32 %v252_v8, %v929_v9  ;;  %v288_v6 = vadd.f32 %v287_v45, %v995_v31  ;;  %v357_v48 = vstv %s1298_s8  ;;  %s1434_s19 = sld [smem:[#allocation2 + $0x80]]  ;;  %s1440_s20 = sld [smem:[#allocation2 + $0x72]] }
  0x4e   :  { %v323_v30 = vadd.f32 %v322_v47, %v1057_v11  ;;  %v392_v46 = vstv %s1300_s9  ;;  %v358_v9 = vadd.f32 %v357_v48, %v1123_v55  ;;  %v514_v50 = vstv %s1266_s3  ;;  %s1446_s21 = sld [smem:[#allocation2 + $0x81]]  ;;  %s1448_s22 = sld [smem:[#allocation2 + $0x86]] }
  0x4f   :  { %v222_v51 = vadd.f32 %v894_v0, %v219_v61  ;;  %v256_v63 = vadd.f32 %v932_v10, %v253_v21  ;;  %v291_v8 = vadd.f32 %v998_v32, %v288_v6  ;;  %v393_v45 = vadd.f32 %v392_v46, %v1185_v29  ;;  %s1456_s23 = sld [smem:[#allocation2 + $0x87]]  ;;  %s1466_s24 = sld [smem:[#allocation2 + $0x6c]] }
  0x50   :  { %v326_v52 = vadd.f32 %v1060_v12, %v323_v30  ;;  %v517_v47 = vstv %s1268_s4  ;;  %v530_v20 = vstv %s1306_s10  ;;  %v534_v0 = vstv %s1308_s11  ;;  %s1468_s25 = sld [smem:[#allocation2 + $0x73]]  ;;  %s1477_s26 = sld [smem:[#allocation2 + $0x88]] }
  0x51   :  { %v225_v31 = vadd.f32 %v897_v1, %v222_v51  ;;  %v259_v11 = vadd.f32 %v963_v23, %v256_v63  ;;  %v294_v10 = vadd.f32 %v1001_v33, %v291_v8  ;;  %v427_v48 = vstv %s1322_s12  ;;  %v1603_v63 = vld [vmem:[#allocation36_spill] sm:$0xff]  ;;  %v1605_v8 = vld [vmem:[#allocation21_spill] sm:$0xff]  ;;  %s1484_s27 = sld [smem:[#allocation2 + $0x74]]  ;;  %s1491_s28 = sld [smem:[#allocation2 + $0x6d]] }
  0x52   :  { %v329_v61 = vadd.f32 %v1067_v13, %v326_v52  ;;  %v462_v55 = vstv %s1324_s13  ;;  %v248_v21 = vstv %s1338_s14  ;;  %v361_v46 = vadd.f32 %v1126_v56, %v358_v9  ;;  %v1604_v9 = vld [vmem:[#allocation17_spill] sm:$0xff]  ;;  %s1493_s5 = sld [smem:[#allocation2 + $0x75]]  ;;  %s1504_s6 = sld [smem:[#allocation2 + $0x76]] }
  0x53   :  { %v228_v32 = vadd.f32 %v900_v2, %v225_v31  ;;  %v262_v12 = vadd.f32 %v966_v24, %v259_v11  ;;  %v282_v29 = vstv %s1352_s15  ;;  %v297_v51 = vadd.f32 %v1004_v34, %v294_v10  ;;  %v1607_v31 = vld [vmem:[#allocation44_spill] sm:$0xff]  ;;  %v1608_v11 = vld [vmem:[#allocation11_spill] sm:$0xff]  ;;  %v1609_v10 = vld [vmem:[#allocation14_spill] sm:$0xff]  ;;  %s1506_s0 = sld [smem:[#allocation2 + $0x89]]  ;;  %s711_s3 = sld [smem:[#allocation2 + $0x8b]] }
  0x54   :  { %v332_v1 = vadd.f32 %v1070_v14, %v329_v61  ;;  %v396_v23 = vadd.f32 %v1188_v7, %v393_v45  ;;  %v364_v13 = vadd.f32 %v1129_v17, %v361_v46  ;;  %v428_v2 = vadd.f32 %v427_v48, %v1239_v62  ;;  %v1606_v45 = vld [vmem:[#allocation30_spill] sm:$0xff]  ;;  %v1610_v61 = vld [vmem:[#allocation25_spill] sm:$0xff]  ;;  %v1614_v46 = vld [vmem:[#allocation31_spill] sm:$0xff]  ;;  %s712_s4 = sld [smem:[#allocation2 + $0x8c]] }
  0x55   :  { %v231_v33 = vadd.f32 %v907_v3, %v228_v32  ;;  %v265_v52 = vadd.f32 %v969_v25, %v262_v12  ;;  %v300_v6 = vadd.f32 %v1035_v57, %v297_v51  ;;  %v317_v24 = vstv %s1362_s16  ;;  %v1611_v48 = vld [vmem:[#allocation37_spill] sm:$0xff]  ;;  %v1613_v32 = vld [vmem:[#allocation22_spill] sm:$0xff] }
  0x56   :  { %v335_v56 = vadd.f32 %v1073_v15, %v332_v1  ;;  %v399_v30 = vadd.f32 %v1195_v35, %v396_v23  ;;  %v367_v7 = vadd.f32 %v1132_v18, %v364_v13  ;;  %v431_v3 = vadd.f32 %v1242_v53, %v428_v2  ;;  %v1615_v23 = vld [vmem:[#allocation12_spill] sm:$0xff]  ;;  %v1617_v2 = vld [vmem:[#allocation26_spill] sm:$0xff] }
  0x57   :  { %v234_v34 = vadd.f32 %v910_v4, %v231_v33  ;;  %v268_v14 = vadd.f32 %v972_v26, %v265_v52  ;;  %v303_v25 = vadd.f32 %v1038_v58, %v300_v6  ;;  %v463_v57 = vadd.f32 %v462_v55, %v1277_v60  ;;  %v1616_v52 = vld [vmem:[#allocation15_spill] sm:$0xff] }
  0x58   :  { %v338_v17 = vadd.f32 %v1076_v16, %v335_v56  ;;  %v402_v62 = vadd.f32 %v1198_v36, %v399_v30  ;;  %v370_v4 = vadd.f32 %v1139_v19, %v367_v7  ;;  %v434_v26 = vadd.f32 %v1603_v63, %v431_v3  ;;  %v1612_v19 = vld [vmem:[#allocation18_spill] sm:$0xff]  ;;  %v1620_v7 = vld [vmem:[#allocation23_spill] sm:$0xff] }
  0x59   :  { %v237_v15 = vadd.f32 %v913_v5, %v234_v34  ;;  %v271_v35 = vadd.f32 %v979_v27, %v268_v14  ;;  %v306_v18 = vadd.f32 %v1604_v9, %v303_v25  ;;  %v466_v16 = vadd.f32 %v1607_v31, %v463_v57  ;;  %v1618_v56 = vld [vmem:[#allocation38_spill] sm:$0xff]  ;;  %v1619_v34 = vld [vmem:[#allocation19_spill] sm:$0xff]  ;;  %v1621_v25 = vld [vmem:[#allocation32_spill] sm:$0xff] }
  0x5a   :  { %v341_v53 = vadd.f32 %v1605_v8, %v338_v17  ;;  %v405_v58 = vadd.f32 %v1606_v45, %v402_v62  ;;  %v373_v5 = vadd.f32 %v1610_v61, %v370_v4  ;;  %v437_v27 = vadd.f32 %v1611_v48, %v434_v26  ;;  %v1622_v62 = vld [vmem:[#allocation13_spill] sm:$0xff]  ;;  %v1624_v4 = vld [vmem:[#allocation27_spill] sm:$0xff] }
  0x5b   :  { %v240_v36 = vadd.f32 %v1608_v11, %v237_v15  ;;  %v274_v60 = vadd.f32 %v1609_v10, %v271_v35  ;;  %v309_v55 = vadd.f32 %v1612_v19, %v306_v18  ;;  %v469_v1 = vadd.f32 %v1311_v37, %v466_v16  ;;  %v1623_v15 = vld [vmem:[#allocation16_spill] sm:$0xff]  ;;  %v1625_v26 = vld [vmem:[#allocation39_spill] sm:$0xff]  ;;  %v1628_v45 = vld [vmem:[#allocation33_spill] sm:$0xff] }
  0x5c   :  { %v344_v12 = vadd.f32 %v1613_v32, %v341_v53  ;;  %v408_v51 = vadd.f32 %v1614_v46, %v405_v58  ;;  %v376_v6 = vadd.f32 %v1617_v2, %v373_v5  ;;  %v440_v30 = vadd.f32 %v1618_v56, %v437_v27  ;;  %v1626_v18 = vld [vmem:[#allocation20_spill] sm:$0xff]  ;;  %v1631_v27 = vld [vmem:[#allocation34_spill] sm:$0xff] }
  0x5d   :  { %v243_v33 = vadd.f32 %v1615_v23, %v240_v36  ;;  %v277_v13 = vadd.f32 %v1616_v52, %v274_v60  ;;  %v312_v14 = vadd.f32 %v1619_v34, %v309_v55  ;;  %v472_v17 = vadd.f32 %v1314_v49, %v469_v1  ;;  %v1627_v53 = vld [vmem:[#allocation24_spill] sm:$0xff] }
  0x5e   :  { %v347_v3 = vadd.f32 %v1620_v7, %v344_v12  ;;  %v411_v37 = vadd.f32 %v1621_v25, %v408_v51  ;;  %v379_v63 = vadd.f32 %v1624_v4, %v376_v6  ;;  %v443_v9 = vadd.f32 %v1625_v26, %v440_v30  ;;  %v1629_v36 = vld [vmem:[#allocation28_spill] sm:$0xff]  ;;  %v1632_v12 = vld [vmem:[#allocation29_spill] sm:$0xff]  ;;  %v1638_v4 = vld [vmem:[#allocation43_spill] sm:$0xff] }
  0x5f   :  { %v246_v57 = vadd.f32 %v1622_v62, %v243_v33  ;;  %v280_v35 = vadd.f32 %v1623_v15, %v277_v13  ;;  %v315_v8 = vadd.f32 %v1626_v18, %v312_v14  ;;  %v475_v31 = vadd.f32 %v1317_v59, %v472_v17  ;;  %v1630_v60 = vld [vmem:[#allocation40_spill] sm:$0xff]  ;;  %v1633_v51 = vld [vmem:[#allocation41_spill] sm:$0xff]  ;;  %v1639_v18 = vld [vmem:[#allocation46_spill] sm:$0xff] }
  0x60   :  { %v350_v49 = vadd.f32 %v1627_v53, %v347_v3  ;;  %v414_v58 = vadd.f32 %v1628_v45, %v411_v37  ;;  %v382_v10 = vadd.f32 %v1629_v36, %v379_v63  ;;  %v446_v61 = vadd.f32 %v1630_v60, %v443_v9  ;;  %v1642_v45 = vld [vmem:[#allocation7_spill] sm:$0xff] }
  0x61   :  { %v247_v16 = vmax.f32 %v246_v57, 0.0  ;;  %v281_v11 = vmax.f32 %v280_v35, 0.0  ;;  %v316_v5 = vmax.f32 %v315_v8, 0.0  ;;  %v478_v59 = vadd.f32 %v1320_v42, %v475_v31 }
  0x62   :  { %v351_v48 = vmax.f32 %v350_v49, 0.0  ;;  %v417_v19 = vadd.f32 %v1631_v27, %v414_v58  ;;  %v385_v46 = vadd.f32 %v1632_v12, %v382_v10  ;;  %v449_v1 = vadd.f32 %v1633_v51, %v446_v61  ;;  %v1645_v12 = vld [vmem:[#allocation8_spill] sm:$0xff] }
  0x63   :  { %v249_v55 = vmul.f32 %v248_v21, %v247_v16  ;;  %v283_v32 = vmul.f32 %v282_v29, %v281_v11  ;;  %v318_v23 = vmul.f32 %v317_v24, %v316_v5  ;;  %v352_v33 = vstv %s1420_s17  ;;  %v1634_v24 = vld [vmem:[#allocation35_spill] sm:$0xff] }
  0x64   :  { %v481_v52 = vadd.f32 %v1327_v22, %v478_v59  ;;  %v531_v42 = vmul.f32 %v530_v20, %v830_v39  ;;  %v535_v29 = vmul.f32 %v534_v0, %v832_v40  ;;  %v537_v13 = vstv %s1426_s18  ;;  %v1635_v22 = vld [vmem:[#allocation42_spill] sm:$0xff]  ;;  %v1636_v0 = vld [vmem:[#allocation5_spill] sm:$0xff]  ;;  %v1643_v11 = vld [vmem:[#allocation47_spill] sm:$0xff] }
  0x65   :  { %v284_v21 = vadd.f32 %v283_v32, %v249_v55  ;;  %v540_v2 = vstv %s1428_s1  ;;  %v420_v6 = vadd.f32 %v1634_v24, %v417_v19  ;;  %v452_v56 = vadd.f32 %v1635_v22, %v449_v1 }
  0x66   :  { %v484_v39 = vadd.f32 %v1330_v41, %v481_v52  ;;  %v497_v20 = vstv %s1434_s19  ;;  %v353_v34 = vmul.f32 %v352_v33, %v351_v48  ;;  %v386_v14 = vmax.f32 %v385_v46, 0.0  ;;  %v1644_v48 = vld [vmem:[#allocation45_spill] sm:$0xff] }
  0x67   :  { %v319_v30 = vadd.f32 %v318_v23, %v284_v21  ;;  %v498_v7 = vadd.f32 %v497_v20, %v1341_v54  ;;  %v387_v40 = vstv %s1448_s22  ;;  %v1637_v3 = vstv %s1250_s29  ;;  %s1512_s29 = sld [smem:[#allocation2 + $0x77]]  ;;  %v1646_v33 = vld [vmem:[#allocation9_spill] sm:$0xff] }
  0x68   :  { %v509_v25 = vmul.f32 %v1637_v3, %v1636_v0  ;;  %v532_v37 = vstv %s1446_s21  ;;  %v543_v17 = vstv %s1440_s20  ;;  %v538_v57 = vmul.f32 %v537_v13, %v838_v43 }
  0x69   :  { %v501_v41 = vadd.f32 %v1344_v28, %v498_v7  ;;  %v533_v62 = vadd.f32 %v532_v37, %v531_v42  ;;  %v541_v54 = vmul.f32 %v540_v2, %v840_v44  ;;  %v421_v15 = vmax.f32 %v420_v6, 0.0  ;;  %v1640_v44 = vld [vmem:[#allocation6_spill] sm:$0xff] }
  0x6a   :  { %v422_v35 = vstv %s1456_s23  ;;  %v455_v63 = vadd.f32 %v1638_v4, %v452_v56  ;;  %v487_v26 = vadd.f32 %v1333_v38, %v484_v39  ;;  %v354_v28 = vadd.f32 %v353_v34, %v319_v30  ;;  %v1647_v30 = vld [vmem:[#allocation10_spill] sm:$0xff] }
  0x6b   :  { %v388_v9 = vmul.f32 %v387_v40, %v386_v14  ;;  %v504_v8 = vadd.f32 %v1639_v18, %v501_v41  ;;  %v536_v43 = vadd.f32 %v535_v29, %v533_v62  ;;  %v1641_v53 = vstv %s1252_s30  ;;  %s710_s30 = sld [smem:[#allocation2 + $0x8a]] }
  0x6c   :  { %v512_v49 = vmul.f32 %v1641_v53, %v1640_v44  ;;  %v515_v58 = vmul.f32 %v514_v50, %v1642_v45  ;;  %v520_v31 = vstv %s1466_s24  ;;  %v546_v16 = vstv %s1468_s25 }
  0x6d   :  { %v457_v38 = vstv %s1477_s26  ;;  %v507_v36 = vadd.f32 %v1643_v11, %v504_v8  ;;  %v539_v10 = vadd.f32 %v538_v57, %v536_v43  ;;  %v544_v60 = vmul.f32 %v543_v17, %v1636_v0 }
  0x6e   :  { %v423_v61 = vmul.f32 %v422_v35, %v421_v15  ;;  %v456_v5 = vmax.f32 %v455_v63, 0.0  ;;  %v490_v27 = vadd.f32 %v1644_v48, %v487_v26  ;;  %v549_v19 = vstv %s1484_s27 }
  0x6f   :  { %v389_v59 = vadd.f32 %v388_v9, %v354_v28  ;;  %v510_v55 = vadd.f32 %v509_v25, %v507_v36  ;;  %v542_v50 = vadd.f32 %v541_v54, %v539_v10  ;;  %v547_v32 = vmul.f32 %v546_v16, %v1640_v44 }
  0x70   :  { %v518_v46 = vmul.f32 %v517_v47, %v1645_v12  ;;  %v523_v51 = vstv %s1491_s28  ;;  %v552_v1 = vstv %s1493_s5  ;;  %v521_v52 = vmul.f32 %v520_v31, %v1646_v33 }
  0x71   :  { %v513_v23 = vadd.f32 %v512_v49, %v510_v55  ;;  %v545_v42 = vadd.f32 %v544_v60, %v542_v50  ;;  %v550_v21 = vmul.f32 %v549_v19, %v1642_v45  ;;  %v458_v29 = vmul.f32 %v457_v38, %v456_v5 }
  0x72   :  { %v491_v13 = vmax.f32 %v490_v27, 0.0  ;;  %v492_v2 = vstv %s1506_s0  ;;  %v555_v24 = vstv %s1504_s6  ;;  %v424_v6 = vadd.f32 %v423_v61, %v389_v59 }
  0x73   :  { %v516_v22 = vadd.f32 %v515_v58, %v513_v23  ;;  %v548_v56 = vadd.f32 %v547_v32, %v545_v42  ;;  %v553_v39 = vmul.f32 %v552_v1, %v1645_v12  ;;  %v558_v47 = vstv %s1512_s29 }
  0x74   :  { %v524_v34 = vmul.f32 %v523_v51, %v1647_v30  ;;  %v556_v7 = vmul.f32 %v555_v24, %v1646_v33  ;;  %v493_v40 = vmul.f32 %v492_v2, %v491_v13  ;;  %v459_v0 = vadd.f32 %v458_v29, %v424_v6 }
  0x75   :  { %v519_v20 = vadd.f32 %v518_v46, %v516_v22  ;;  %v551_v14 = vadd.f32 %v550_v21, %v548_v56  ;;  %v559_v37 = vmul.f32 %v558_v47, %v1647_v30  ;;  %v527_v62 = vstv %s710_s30 }
  0x76   :  { %v494_v57 = vadd.f32 %v493_v40, %v459_v0  ;;  %v562_v35 = vstv %s711_s3  ;;  %v565_v9 = vstv %s712_s4 }
  0x77   :  { %v522_v3 = vadd.f32 %v521_v52, %v519_v20  ;;  %v554_v25 = vadd.f32 %v553_v39, %v551_v14 }
  0x79   :  { %v525_v17 = vadd.f32 %v524_v34, %v522_v3  ;;  %v557_v41 = vadd.f32 %v556_v7, %v554_v25 }
  0x7b   :  { %v526_v54 = vmax.f32 %v525_v17, 0.0  ;;  %v560_v15 = vadd.f32 %v559_v37, %v557_v41 }
  0x7d   :  { %v528_v4 = vmul.f32 %v527_v62, %v526_v54  ;;  %v561_v63 = vmax.f32 %v560_v15, 0.0 }
  0x7f   :  { %v529_v26 = vadd.f32 %v528_v4, %v494_v57  ;;  %v563_v28 = vmul.f32 %v562_v35, %v561_v63 }
  0x81   :  { %v564_v18 = vadd.f32 %v563_v28, %v529_v26 }
  0x83   :  { %v566_v8 = vadd.f32 %v565_v9, %v564_v18 }
  0x85   :  { %567 = vst [vmem:[%s1547_s2] sm:$0xff] %v566_v8 }
  0x86   :  { %572 = vsyncpa [#allocation3], 1 }

</bundles_post_ra>
